<compile_context>
chip_gen: v6e
topology: v6e:2x2x1
jax: 0.10.0
libtpu: 0.0.40
codegen_flags: <defaults>
</compile_context>

<pallas_src>
import functools

import jax
import jax.numpy as jnp
from jax.experimental import pallas as pl
from jax.experimental.pallas import tpu as pltpu


# ---------------------------------------------------------------------------
# Pallas kernels
# ---------------------------------------------------------------------------
def _matmul_bias_act_kernel(x_ref, w_ref, b_ref, o_ref, *, apply_relu):
    acc = jnp.dot(x_ref[...], w_ref[...], preferred_element_type=jnp.float32)
    acc = acc + b_ref[...]                      # (1, N) broadcasts over rows
    if apply_relu:
        acc = jnp.maximum(acc, 0.0)
    o_ref[...] = acc.astype(o_ref.dtype)


def _fused_fc_kernel(x_ref, w1_ref, b1_ref, w2_ref, b2_ref, o_ref):
    # fc1 + ReLU, hidden stays in VMEM/vregs, then fc2 -- one kernel, no HBM
    # round trip for the 512-wide hidden activation.
    h = jnp.dot(x_ref[...], w1_ref[...], preferred_element_type=jnp.float32)
    h = jnp.maximum(h + b1_ref[...], 0.0)
    q = jnp.dot(h, w2_ref[...], preferred_element_type=jnp.float32)
    o_ref[...] = (q + b2_ref[...]).astype(o_ref.dtype)


def pallas_linear(x, w, b2, *, relu, tm=256):
    """y = x @ w + b (optionally ReLU).  x:[M,K], w:[K,N], b2:[1,N] -> [M,N]."""
    M, K = x.shape
    N = w.shape[1]
    tile_m = M if M <= tm else tm               # tm=256 is (8)-aligned
    grid_m = pl.cdiv(M, tile_m)
    cost = pl.CostEstimate(
        flops=2 * M * K * N,
        transcendentals=0,
        bytes_accessed=4 * (M * K + K * N + N + M * N))
    kernel = functools.partial(_matmul_bias_act_kernel, apply_relu=relu)
    return pl.pallas_call(
        kernel,
        out_shape=jax.ShapeDtypeStruct((M, N), jnp.float32),
        grid=(grid_m,),
        in_specs=[
            pl.BlockSpec((tile_m, K), lambda i: (i, 0)),   # streamed rows
            pl.BlockSpec((K, N), lambda i: (0, 0)),        # resident weight
            pl.BlockSpec((1, N), lambda i: (0, 0)),        # resident bias
        ],
        out_specs=pl.BlockSpec((tile_m, N), lambda i: (i, 0)),
        compiler_params=pltpu.CompilerParams(
            dimension_semantics=("parallel",)),
        cost_estimate=cost,
    )(x, w, b2)


def pallas_fused_fc(x, w1, b1_2d, w2, b2_2d, *, tm=256):
    """q = relu(x @ w1 + b1) @ w2 + b2 in one kernel."""
    M, K = x.shape
    H = w1.shape[1]
    N = w2.shape[1]
    tile_m = M if M <= tm else tm
    grid_m = pl.cdiv(M, tile_m)
    cost = pl.CostEstimate(
        flops=2 * M * K * H + 2 * M * H * N,
        transcendentals=0,
        bytes_accessed=4 * (M * K + K * H + H + H * N + N + M * N))
    return pl.pallas_call(
        _fused_fc_kernel,
        out_shape=jax.ShapeDtypeStruct((M, N), jnp.float32),
        grid=(grid_m,),
        in_specs=[
            pl.BlockSpec((tile_m, K), lambda i: (i, 0)),
            pl.BlockSpec((K, H), lambda i: (0, 0)),
            pl.BlockSpec((1, H), lambda i: (0, 0)),
            pl.BlockSpec((H, N), lambda i: (0, 0)),
            pl.BlockSpec((1, N), lambda i: (0, 0)),
        ],
        out_specs=pl.BlockSpec((tile_m, N), lambda i: (i, 0)),
        compiler_params=pltpu.CompilerParams(
            dimension_semantics=("parallel",)),
        cost_estimate=cost,
    )(x, w1, b1_2d, w2, b2_2d)


# ---------------------------------------------------------------------------
# im2col glue (plain JAX, NHWC, fused by jit): (N,H,W,C) -> (N*OH*OW, KH*KW*C)
# feature order is (kh, kw, c); the conv weights are pre-permuted to match.
# TODO(synk): fold the unfold into the kernel as a (m_tile, kh*kw) grid with
# K-accumulation to avoid materializing the duplicated patch matrix in HBM.
# ---------------------------------------------------------------------------
def im2col_nhwc(x, kh, kw, stride):
    n, h, w, c = x.shape
    oh = (h - kh) // stride + 1
    ow = (w - kw) // stride + 1
    cols = []
    for i in range(kh):
        for j in range(kw):
            cols.append(
                x[:, i:i + stride * oh:stride, j:j + stride * ow:stride, :])
    p = jnp.stack(cols, axis=3)                  # (N, OH, OW, KH*KW, C)
    return p.reshape(n * oh * ow, kh * kw * c), oh, ow


def conv2d_nhwc(x, w2d, b2d, kh, kw, stride, *, relu):
    """x: [N,H,W,C], w2d: [KH*KW*C, OutC], b2d: [1,OutC] -> [N,OH,OW,OutC]."""
    n = x.shape[0]
    patches, oh, ow = im2col_nhwc(x, kh, kw, stride)
    y = pallas_linear(patches, w2d, b2d, relu=relu)     # (N*OH*OW, OutC)
    return y.reshape(n, oh, ow, -1)


# ---------------------------------------------------------------------------
# Parameters (PyTorch layout) + one-time preparation into the kernel layout
# ---------------------------------------------------------------------------
def _conv_out_hw(h, w, k, s):
    return (h - k) // s + 1, (w - k) // s + 1


def init_params(key, input_dim, n_actions):
    c_in, h, w = input_dim
    h1, w1 = _conv_out_hw(h, w, 8, 4)
    h2, w2 = _conv_out_hw(h1, w1, 4, 2)
    h3, w3 = _conv_out_hw(h2, w2, 3, 1)
    conv_out_size = 64 * h3 * w3

    keys = jax.random.split(key, 10)

    def winit(k, shape, fan_in):
        return jax.random.normal(k, shape, jnp.float32) / jnp.sqrt(fan_in)

    params = {
        "c1_w": winit(keys[0], (32, c_in, 8, 8), c_in * 64),
        "c1_b": winit(keys[1], (32,), c_in * 64),
        "c2_w": winit(keys[2], (64, 32, 4, 4), 32 * 16),
        "c2_b": winit(keys[3], (64,), 32 * 16),
        "c3_w": winit(keys[4], (64, 64, 3, 3), 64 * 9),
        "c3_b": winit(keys[5], (64,), 64 * 9),
        "fc1_w": winit(keys[6], (512, conv_out_size), conv_out_size),
        "fc1_b": winit(keys[7], (512,), conv_out_size),
        "fc2_w": winit(keys[8], (n_actions, 512), 512),
        "fc2_b": winit(keys[9], (n_actions,), 512),
    }
    return params, conv_out_size


def prepare_params(params, input_dim):
    """One-time weight permutations so the forward pass does none."""
    _, h, w = input_dim
    h1, w1 = _conv_out_hw(h, w, 8, 4)
    h2, w2 = _conv_out_hw(h1, w1, 4, 2)
    h3, w3 = _conv_out_hw(h2, w2, 3, 1)

    def conv_w(wt):  # (OutC, InC, KH, KW) -> (KH*KW*InC, OutC), matches im2col
        outc, inc, kh, kw = wt.shape
        return wt.transpose(2, 3, 1, 0).reshape(kh * kw * inc, outc)

    # fc1 columns are ordered (C=64, H3, W3) for PyTorch's NCHW flatten;
    # permute once to the NHWC flatten order (H3, W3, C).
    fc1_w = params["fc1_w"].reshape(512, 64, h3, w3)
    fc1_w = fc1_w.transpose(0, 2, 3, 1).reshape(512, -1).T   # (h3*w3*64, 512)

    return {
        "c1_w": conv_w(params["c1_w"]), "c1_b": params["c1_b"].reshape(1, -1),
        "c2_w": conv_w(params["c2_w"]), "c2_b": params["c2_b"].reshape(1, -1),
        "c3_w": conv_w(params["c3_w"]), "c3_b": params["c3_b"].reshape(1, -1),
        "fc1_w": fc1_w,                 "fc1_b": params["fc1_b"].reshape(1, -1),
        "fc2_w": params["fc2_w"].T,     "fc2_b": params["fc2_b"].reshape(1, -1),
    }


# ---------------------------------------------------------------------------
# DQNHuman forward (jitted end-to-end)
# ---------------------------------------------------------------------------
@jax.jit
def dqn_forward(prepared, x_nchw):
    x = x_nchw.transpose(0, 2, 3, 1)                         # NCHW -> NHWC once
    h = conv2d_nhwc(x, prepared["c1_w"], prepared["c1_b"], 8, 8, 4, relu=True)
    h = conv2d_nhwc(h, prepared["c2_w"], prepared["c2_b"], 4, 4, 2, relu=True)
    h = conv2d_nhwc(h, prepared["c3_w"], prepared["c3_b"], 3, 3, 1, relu=True)
    flat = h.reshape(h.shape[0], -1)                         # NHWC flatten
    return pallas_fused_fc(flat, prepared["fc1_w"], prepared["fc1_b"],
                           prepared["fc2_w"], prepared["fc2_b"])


# ---------------------------------------------------------------------------
# Pure-JAX reference (PyTorch semantics, NCHW) for the correctness check
# ---------------------------------------------------------------------------
def dqn_reference(params, x):
    def conv(x, w, b, s):
        y = jax.lax.conv_general_dilated(
            x, w, window_strides=(s, s), padding="VALID",
            dimension_numbers=("NCHW", "OIHW", "NCHW"))
        return jnp.maximum(y + b[None, :, None, None], 0.0)

    h = conv(x, params["c1_w"], params["c1_b"], 4)
    h = conv(h, params["c2_w"], params["c2_b"], 2)
    h = conv(h, params["c3_w"], params["c3_b"], 1)
    flat = h.reshape(h.shape[0], -1)
    h = jnp.maximum(flat @ params["fc1_w"].T + params["fc1_b"], 0.0)
    return h @ params["fc2_w"].T + params["fc2_b"]


if __name__ == "__main__":
    # Small but valid shapes for the DQN conv chain:
    # 44 -> (44-8)/4+1 = 10 -> (10-4)/2+1 = 4 -> (4-3)/1+1 = 2  => conv_out = 64*2*2 = 256
    input_dim = (4, 44, 44)
    n_actions = 6
    batch = 2

    key = jax.random.PRNGKey(0)
    k_param, k_x = jax.random.split(key)
    params, conv_out_size = init_params(k_param, input_dim, n_actions)
    prepared = prepare_params(params, input_dim)
    x = jax.random.normal(k_x, (batch,) + input_dim, jnp.float32)

    q = dqn_forward(prepared, x)
    q = jax.block_until_ready(q)

    q_ref = dqn_reference(params, x)
    assert q.shape == (batch, n_actions), q.shape
    assert jnp.allclose(q, q_ref, atol=1e-4, rtol=1e-4), (
        float(jnp.max(jnp.abs(q - q_ref))))

    print("KERNEL_OK")
</pallas_src>

<mosaic_0001>
module attributes {stable_mosaic.version = 11 : i64} {
  func.func @_matmul_bias_act_kernel(%arg0: i32, %arg1: memref<200x256xf32, #tpu.memory_space<vmem>>, %arg2: memref<256x32xf32, #tpu.memory_space<vmem>>, %arg3: memref<1x32xf32, #tpu.memory_space<vmem>>, %arg4: memref<200x32xf32, #tpu.memory_space<vmem>>) attributes {dimension_semantics = [#tpu.dimension_semantics<parallel>], iteration_bounds = array<i64: 1>, scalar_prefetch = 0 : i64, scratch_operands = 0 : i64, tpu.core_type = #tpu.core_type<tc>, window_params = [{transform_indices = @transform_0, window_bounds = array<i64: 200, 256>}, {pipeline_mode = #tpu.pipeline_mode<synchronous>, transform_indices = @transform_1, window_bounds = array<i64: 256, 32>}, {pipeline_mode = #tpu.pipeline_mode<synchronous>, transform_indices = @transform_2, window_bounds = array<i64: 1, 32>}, {transform_indices = @transform_3, window_bounds = array<i64: 200, 32>}]} {
    %c0 = arith.constant 0 : index
    %c0_0 = arith.constant 0 : index
    %0 = vector.load %arg1[%c0, %c0_0] : memref<200x256xf32, #tpu.memory_space<vmem>>, vector<200x256xf32>
    %c0_1 = arith.constant 0 : index
    %c0_2 = arith.constant 0 : index
    %1 = vector.load %arg2[%c0_1, %c0_2] : memref<256x32xf32, #tpu.memory_space<vmem>>, vector<256x32xf32>
    %cst = arith.constant dense<0.000000e+00> : vector<200x32xf32>
    %2 = tpu.matmul %0, %1, %cst {dimension_numbers = #tpu.dot_dimension_numbers<[1], [0], [0], [1], [0, 0, 1, 1], [], []>} : vector<200x256xf32>, vector<256x32xf32>, vector<200x32xf32> -> vector<200x32xf32>
    %c0_3 = arith.constant 0 : index
    %c0_4 = arith.constant 0 : index
    %3 = vector.load %arg3[%c0_3, %c0_4] : memref<1x32xf32, #tpu.memory_space<vmem>>, vector<1x32xf32>
    %4 = vector.broadcast %3 : vector<1x32xf32> to vector<200x32xf32>
    %5 = arith.addf %2, %4 : vector<200x32xf32>
    %cst_5 = arith.constant 0.000000e+00 : f32
    %6 = vector.broadcast %cst_5 : f32 to vector<200x32xf32>
    %7 = arith.maximumf %5, %6 : vector<200x32xf32>
    %c0_6 = arith.constant 0 : index
    %c0_7 = arith.constant 0 : index
    %8 = vector.load %arg4[%c0_6, %c0_7] : memref<200x32xf32, #tpu.memory_space<vmem>>, vector<200x32xf32>
    tpu.vector_store %arg4[%c0_6, %c0_7], %7 {strides = array<i32>} : memref<200x32xf32, #tpu.memory_space<vmem>>, vector<200x32xf32>,
    return
  }
  func.func @transform_0(%arg0: i32) -> (i32, i32) {
    %c0_i32 = arith.constant 0 : i32
    %c0_i32_0 = arith.constant 0 : i32
    return %arg0, %c0_i32 : i32, i32
  }
  func.func @transform_1(%arg0: i32) -> (i32, i32) {
    %c0_i32 = arith.constant 0 : i32
    %c0_i32_0 = arith.constant 0 : i32
    %c0_i32_1 = arith.constant 0 : i32
    return %c0_i32, %c0_i32_0 : i32, i32
  }
  func.func @transform_2(%arg0: i32) -> (i32, i32) {
    %c0_i32 = arith.constant 0 : i32
    %c0_i32_0 = arith.constant 0 : i32
    %c0_i32_1 = arith.constant 0 : i32
    return %c0_i32, %c0_i32_0 : i32, i32
  }
  func.func @transform_3(%arg0: i32) -> (i32, i32) {
    %c0_i32 = arith.constant 0 : i32
    %c0_i32_0 = arith.constant 0 : i32
    return %arg0, %c0_i32 : i32, i32
  }
}

module attributes {stable_mosaic.version = 11 : i64} {
  func.func @_matmul_bias_act_kernel(%arg0: i32, %arg1: memref<32x512xf32, #tpu.memory_space<vmem>>, %arg2: memref<512x64xf32, #tpu.memory_space<vmem>>, %arg3: memref<1x64xf32, #tpu.memory_space<vmem>>, %arg4: memref<32x64xf32, #tpu.memory_space<vmem>>) attributes {dimension_semantics = [#tpu.dimension_semantics<parallel>], iteration_bounds = array<i64: 1>, scalar_prefetch = 0 : i64, scratch_operands = 0 : i64, tpu.core_type = #tpu.core_type<tc>, window_params = [{transform_indices = @transform_0, window_bounds = array<i64: 32, 512>}, {pipeline_mode = #tpu.pipeline_mode<synchronous>, transform_indices = @transform_1, window_bounds = array<i64: 512, 64>}, {pipeline_mode = #tpu.pipeline_mode<synchronous>, transform_indices = @transform_2, window_bounds = array<i64: 1, 64>}, {transform_indices = @transform_3, window_bounds = array<i64: 32, 64>}]} {
    %c0 = arith.constant 0 : index
    %c0_0 = arith.constant 0 : index
    %0 = vector.load %arg1[%c0, %c0_0] : memref<32x512xf32, #tpu.memory_space<vmem>>, vector<32x512xf32>
    %c0_1 = arith.constant 0 : index
    %c0_2 = arith.constant 0 : index
    %1 = vector.load %arg2[%c0_1, %c0_2] : memref<512x64xf32, #tpu.memory_space<vmem>>, vector<512x64xf32>
    %cst = arith.constant dense<0.000000e+00> : vector<32x64xf32>
    %2 = tpu.matmul %0, %1, %cst {dimension_numbers = #tpu.dot_dimension_numbers<[1], [0], [0], [1], [0, 0, 1, 1], [], []>} : vector<32x512xf32>, vector<512x64xf32>, vector<32x64xf32> -> vector<32x64xf32>
    %c0_3 = arith.constant 0 : index
    %c0_4 = arith.constant 0 : index
    %3 = vector.load %arg3[%c0_3, %c0_4] : memref<1x64xf32, #tpu.memory_space<vmem>>, vector<1x64xf32>
    %4 = vector.broadcast %3 : vector<1x64xf32> to vector<32x64xf32>
    %5 = arith.addf %2, %4 : vector<32x64xf32>
    %cst_5 = arith.constant 0.000000e+00 : f32
    %6 = vector.broadcast %cst_5 : f32 to vector<32x64xf32>
    %7 = arith.maximumf %5, %6 : vector<32x64xf32>
    %c0_6 = arith.constant 0 : index
    %c0_7 = arith.constant 0 : index
    %8 = vector.load %arg4[%c0_6, %c0_7] : memref<32x64xf32, #tpu.memory_space<vmem>>, vector<32x64xf32>
    tpu.vector_store %arg4[%c0_6, %c0_7], %7 {strides = array<i32>} : memref<32x64xf32, #tpu.memory_space<vmem>>, vector<32x64xf32>,
    return
  }
  func.func @transform_0(%arg0: i32) -> (i32, i32) {
    %c0_i32 = arith.constant 0 : i32
    %c0_i32_0 = arith.constant 0 : i32
    return %arg0, %c0_i32 : i32, i32
  }
  func.func @transform_1(%arg0: i32) -> (i32, i32) {
    %c0_i32 = arith.constant 0 : i32
    %c0_i32_0 = arith.constant 0 : i32
    %c0_i32_1 = arith.constant 0 : i32
    return %c0_i32, %c0_i32_0 : i32, i32
  }
  func.func @transform_2(%arg0: i32) -> (i32, i32) {
    %c0_i32 = arith.constant 0 : i32
    %c0_i32_0 = arith.constant 0 : i32
    %c0_i32_1 = arith.constant 0 : i32
    return %c0_i32, %c0_i32_0 : i32, i32
  }
  func.func @transform_3(%arg0: i32) -> (i32, i32) {
    %c0_i32 = arith.constant 0 : i32
    %c0_i32_0 = arith.constant 0 : i32
    return %arg0, %c0_i32 : i32, i32
  }
}

module attributes {stable_mosaic.version = 11 : i64} {
  func.func @_fused_fc_kernel(%arg0: i32, %arg1: memref<2x256xf32, #tpu.memory_space<vmem>>, %arg2: memref<256x512xf32, #tpu.memory_space<vmem>>, %arg3: memref<1x512xf32, #tpu.memory_space<vmem>>, %arg4: memref<512x6xf32, #tpu.memory_space<vmem>>, %arg5: memref<1x6xf32, #tpu.memory_space<vmem>>, %arg6: memref<2x6xf32, #tpu.memory_space<vmem>>) attributes {dimension_semantics = [#tpu.dimension_semantics<parallel>], iteration_bounds = array<i64: 1>, scalar_prefetch = 0 : i64, scratch_operands = 0 : i64, tpu.core_type = #tpu.core_type<tc>, window_params = [{transform_indices = @transform_0, window_bounds = array<i64: 2, 256>}, {pipeline_mode = #tpu.pipeline_mode<synchronous>, transform_indices = @transform_1, window_bounds = array<i64: 256, 512>}, {pipeline_mode = #tpu.pipeline_mode<synchronous>, transform_indices = @transform_2, window_bounds = array<i64: 1, 512>}, {pipeline_mode = #tpu.pipeline_mode<synchronous>, transform_indices = @transform_3, window_bounds = array<i64: 512, 6>}, {pipeline_mode = #tpu.pipeline_mode<synchronous>, transform_indices = @transform_4, window_bounds = array<i64: 1, 6>}, {transform_indices = @transform_5, window_bounds = array<i64: 2, 6>}]} {
    %c0 = arith.constant 0 : index
    %c0_0 = arith.constant 0 : index
    %0 = vector.load %arg1[%c0, %c0_0] : memref<2x256xf32, #tpu.memory_space<vmem>>, vector<2x256xf32>
    %c0_1 = arith.constant 0 : index
    %c0_2 = arith.constant 0 : index
    %1 = vector.load %arg2[%c0_1, %c0_2] : memref<256x512xf32, #tpu.memory_space<vmem>>, vector<256x512xf32>
    %cst = arith.constant dense<0.000000e+00> : vector<2x512xf32>
    %2 = tpu.matmul %0, %1, %cst {dimension_numbers = #tpu.dot_dimension_numbers<[1], [0], [0], [1], [0, 0, 1, 1], [], []>} : vector<2x256xf32>, vector<256x512xf32>, vector<2x512xf32> -> vector<2x512xf32>
    %c0_3 = arith.constant 0 : index
    %c0_4 = arith.constant 0 : index
    %3 = vector.load %arg3[%c0_3, %c0_4] : memref<1x512xf32, #tpu.memory_space<vmem>>, vector<1x512xf32>
    %4 = vector.broadcast %3 : vector<1x512xf32> to vector<2x512xf32>
    %5 = arith.addf %2, %4 : vector<2x512xf32>
    %cst_5 = arith.constant 0.000000e+00 : f32
    %6 = vector.broadcast %cst_5 : f32 to vector<2x512xf32>
    %7 = arith.maximumf %5, %6 : vector<2x512xf32>
    %c0_6 = arith.constant 0 : index
    %c0_7 = arith.constant 0 : index
    %8 = vector.load %arg4[%c0_6, %c0_7] : memref<512x6xf32, #tpu.memory_space<vmem>>, vector<512x6xf32>
    %cst_8 = arith.constant dense<0.000000e+00> : vector<2x6xf32>
    %9 = tpu.matmul %7, %8, %cst_8 {dimension_numbers = #tpu.dot_dimension_numbers<[1], [0], [0], [1], [0, 0, 1, 1], [], []>} : vector<2x512xf32>, vector<512x6xf32>, vector<2x6xf32> -> vector<2x6xf32>
    %c0_9 = arith.constant 0 : index
    %c0_10 = arith.constant 0 : index
    %10 = vector.load %arg5[%c0_9, %c0_10] : memref<1x6xf32, #tpu.memory_space<vmem>>, vector<1x6xf32>
    %11 = vector.broadcast %10 : vector<1x6xf32> to vector<2x6xf32>
    %12 = arith.addf %9, %11 : vector<2x6xf32>
    %c0_11 = arith.constant 0 : index
    %c0_12 = arith.constant 0 : index
    %13 = vector.load %arg6[%c0_11, %c0_12] : memref<2x6xf32, #tpu.memory_space<vmem>>, vector<2x6xf32>
    tpu.vector_store %arg6[%c0_11, %c0_12], %12 {strides = array<i32>} : memref<2x6xf32, #tpu.memory_space<vmem>>, vector<2x6xf32>,
    return
  }
  func.func @transform_0(%arg0: i32) -> (i32, i32) {
    %c0_i32 = arith.constant 0 : i32
    %c0_i32_0 = arith.constant 0 : i32
    return %arg0, %c0_i32 : i32, i32
  }
  func.func @transform_1(%arg0: i32) -> (i32, i32) {
    %c0_i32 = arith.constant 0 : i32
    %c0_i32_0 = arith.constant 0 : i32
    %c0_i32_1 = arith.constant 0 : i32
    return %c0_i32, %c0_i32_0 : i32, i32
  }
  func.func @transform_2(%arg0: i32) -> (i32, i32) {
    %c0_i32 = arith.constant 0 : i32
    %c0_i32_0 = arith.constant 0 : i32
    %c0_i32_1 = arith.constant 0 : i32
    return %c0_i32, %c0_i32_0 : i32, i32
  }
  func.func @transform_3(%arg0: i32) -> (i32, i32) {
    %c0_i32 = arith.constant 0 : i32
    %c0_i32_0 = arith.constant 0 : i32
    %c0_i32_1 = arith.constant 0 : i32
    return %c0_i32, %c0_i32_0 : i32, i32
  }
  func.func @transform_4(%arg0: i32) -> (i32, i32) {
    %c0_i32 = arith.constant 0 : i32
    %c0_i32_0 = arith.constant 0 : i32
    %c0_i32_1 = arith.constant 0 : i32
    return %c0_i32, %c0_i32_0 : i32, i32
  }
  func.func @transform_5(%arg0: i32) -> (i32, i32) {
    %c0_i32 = arith.constant 0 : i32
    %c0_i32_0 = arith.constant 0 : i32
    return %arg0, %c0_i32 : i32, i32
  }
}

module attributes {stable_mosaic.version = 11 : i64} {
  func.func @_matmul_bias_act_kernel(%arg0: i32, %arg1: memref<8x576xf32, #tpu.memory_space<vmem>>, %arg2: memref<576x64xf32, #tpu.memory_space<vmem>>, %arg3: memref<1x64xf32, #tpu.memory_space<vmem>>, %arg4: memref<8x64xf32, #tpu.memory_space<vmem>>) attributes {dimension_semantics = [#tpu.dimension_semantics<parallel>], iteration_bounds = array<i64: 1>, scalar_prefetch = 0 : i64, scratch_operands = 0 : i64, tpu.core_type = #tpu.core_type<tc>, window_params = [{transform_indices = @transform_0, window_bounds = array<i64: 8, 576>}, {pipeline_mode = #tpu.pipeline_mode<synchronous>, transform_indices = @transform_1, window_bounds = array<i64: 576, 64>}, {pipeline_mode = #tpu.pipeline_mode<synchronous>, transform_indices = @transform_2, window_bounds = array<i64: 1, 64>}, {transform_indices = @transform_3, window_bounds = array<i64: 8, 64>}]} {
    %c0 = arith.constant 0 : index
    %c0_0 = arith.constant 0 : index
    %0 = vector.load %arg1[%c0, %c0_0] : memref<8x576xf32, #tpu.memory_space<vmem>>, vector<8x576xf32>
    %c0_1 = arith.constant 0 : index
    %c0_2 = arith.constant 0 : index
    %1 = vector.load %arg2[%c0_1, %c0_2] : memref<576x64xf32, #tpu.memory_space<vmem>>, vector<576x64xf32>
    %cst = arith.constant dense<0.000000e+00> : vector<8x64xf32>
    %2 = tpu.matmul %0, %1, %cst {dimension_numbers = #tpu.dot_dimension_numbers<[1], [0], [0], [1], [0, 0, 1, 1], [], []>} : vector<8x576xf32>, vector<576x64xf32>, vector<8x64xf32> -> vector<8x64xf32>
    %c0_3 = arith.constant 0 : index
    %c0_4 = arith.constant 0 : index
    %3 = vector.load %arg3[%c0_3, %c0_4] : memref<1x64xf32, #tpu.memory_space<vmem>>, vector<1x64xf32>
    %4 = vector.broadcast %3 : vector<1x64xf32> to vector<8x64xf32>
    %5 = arith.addf %2, %4 : vector<8x64xf32>
    %cst_5 = arith.constant 0.000000e+00 : f32
    %6 = vector.broadcast %cst_5 : f32 to vector<8x64xf32>
    %7 = arith.maximumf %5, %6 : vector<8x64xf32>
    %c0_6 = arith.constant 0 : index
    %c0_7 = arith.constant 0 : index
    %8 = vector.load %arg4[%c0_6, %c0_7] : memref<8x64xf32, #tpu.memory_space<vmem>>, vector<8x64xf32>
    tpu.vector_store %arg4[%c0_6, %c0_7], %7 {strides = array<i32>} : memref<8x64xf32, #tpu.memory_space<vmem>>, vector<8x64xf32>,
    return
  }
  func.func @transform_0(%arg0: i32) -> (i32, i32) {
    %c0_i32 = arith.constant 0 : i32
    %c0_i32_0 = arith.constant 0 : i32
    return %arg0, %c0_i32 : i32, i32
  }
  func.func @transform_1(%arg0: i32) -> (i32, i32) {
    %c0_i32 = arith.constant 0 : i32
    %c0_i32_0 = arith.constant 0 : i32
    %c0_i32_1 = arith.constant 0 : i32
    return %c0_i32, %c0_i32_0 : i32, i32
  }
  func.func @transform_2(%arg0: i32) -> (i32, i32) {
    %c0_i32 = arith.constant 0 : i32
    %c0_i32_0 = arith.constant 0 : i32
    %c0_i32_1 = arith.constant 0 : i32
    return %c0_i32, %c0_i32_0 : i32, i32
  }
  func.func @transform_3(%arg0: i32) -> (i32, i32) {
    %c0_i32 = arith.constant 0 : i32
    %c0_i32_0 = arith.constant 0 : i32
    return %arg0, %c0_i32 : i32, i32
  }
}

</mosaic_0001>

<bundles_post_ra>
// kernel: dqn_forward.4
= control target key start
LH: loop header
LB: loop body
LE: loop exit
PB: predicated region body
PF: predicated region fallthrough
CT: control target
= control target key end

     0   :  { %v414_v0 = vmov 0.0   ;;  %vm318_vm0 = vcmask 261120   ;;  %s875_s1 = inlined_call_operand.vmem [shape: f32[256,32], index: 1, kind: input, shape index: {}]   ;;  %s876_s0 = inlined_call_operand.vmem [shape: f32[200,256], index: 0, kind: input, shape index: {}]   ;;  %s877_s2 = inlined_call_operand.vmem [shape: f32[1,32], index: 2, kind: input, shape index: {}]   ;;  %s878_s3 = inlined_call_operand.vmem [shape: f32[200,32], index: 3, kind: output, shape index: {}]  }
   0x1   :  { %103 = vmatprep.subr.mxu0 %v414_v0  ;;  %v79_v1 = vld [vmem:[%s875_s1 + $0x78] sm:$0xff]  ;;  %349 = vmatprep.subr.mxu1 %v414_v0  ;;  %v78_v2 = vld [vmem:[%s875_s1 + $0x70] sm:$0xff]  ;;  %v77_v3 = vld [vmem:[%s875_s1 + $0x68] sm:$0xff] }
   0x2   :  { %104 = vmatpush1.msra.mxu0 %v79_v1  ;;  %381 = vmatpush1.msra.mxu1 %v79_v1  ;;  %v76_v4 = vld [vmem:[%s875_s1 + $0x60] sm:$0xff]  ;;  %v75_v5 = vld [vmem:[%s875_s1 + $0x58] sm:$0xff]  ;;  %v74_v6 = vld [vmem:[%s875_s1 + $0x50] sm:$0xff] }
   0x3   :  { %105 = vmatprep.subr.mxu0 %v414_v0  ;;  %350 = vmatprep.subr.mxu1 %v414_v0  ;;  %v73_v7 = vld [vmem:[%s875_s1 + $0x48] sm:$0xff]  ;;  %v72_v8 = vld [vmem:[%s875_s1 + $0x40] sm:$0xff]  ;;  %v71_v9 = vld [vmem:[%s875_s1 + $0x38] sm:$0xff] }
   0x4   :  { %106 = vmatpush1.msra.mxu0 %v78_v2  ;;  %382 = vmatpush1.msra.mxu1 %v78_v2  ;;  %v70_v10 = vld [vmem:[%s875_s1 + $0x30] sm:$0xff]  ;;  %v69_v11 = vld [vmem:[%s875_s1 + $0x28] sm:$0xff]  ;;  %v68_v12 = vld [vmem:[%s875_s1 + $0x20] sm:$0xff] }
   0x5   :  { %107 = vmatprep.subr.mxu0 %v414_v0  ;;  %351 = vmatprep.subr.mxu1 %v414_v0  ;;  %v67_v13 = vld [vmem:[%s875_s1 + $0x18] sm:$0xff]  ;;  %v66_v14 = vld [vmem:[%s875_s1 + $0x10] sm:$0xff]  ;;  %v65_v15 = vld [vmem:[%s875_s1 + $0x8] sm:$0xff] }
   0x6   :  { %108 = vmatpush1.msra.mxu0 %v77_v3  ;;  %383 = vmatpush1.msra.mxu1 %v77_v3  ;;  %v64_v16 = vld [vmem:[%s875_s1] sm:$0xff]  ;;  %v95_v17 = vld [vmem:[%s875_s1 + $0xf8] sm:$0xff]  ;;  %v94_v18 = vld [vmem:[%s875_s1 + $0xf0] sm:$0xff] }
   0x7   :  { %109 = vmatprep.subr.mxu0 %v414_v0  ;;  %352 = vmatprep.subr.mxu1 %v414_v0  ;;  %v93_v19 = vld [vmem:[%s875_s1 + $0xe8] sm:$0xff]  ;;  %v92_v20 = vld [vmem:[%s875_s1 + $0xe0] sm:$0xff]  ;;  %v91_v21 = vld [vmem:[%s875_s1 + $0xd8] sm:$0xff] }
   0x8   :  { %110 = vmatpush1.msra.mxu0 %v76_v4  ;;  %384 = vmatpush1.msra.mxu1 %v76_v4  ;;  %v90_v22 = vld [vmem:[%s875_s1 + $0xd0] sm:$0xff]  ;;  %v89_v23 = vld [vmem:[%s875_s1 + $0xc8] sm:$0xff]  ;;  %v88_v24 = vld [vmem:[%s875_s1 + $0xc0] sm:$0xff] }
   0x9   :  { %111 = vmatprep.subr.mxu0 %v414_v0  ;;  %353 = vmatprep.subr.mxu1 %v414_v0  ;;  %v87_v25 = vld [vmem:[%s875_s1 + $0xb8] sm:$0xff]  ;;  %v86_v26 = vld [vmem:[%s875_s1 + $0xb0] sm:$0xff]  ;;  %v85_v27 = vld [vmem:[%s875_s1 + $0xa8] sm:$0xff] }
   0xa   :  { %112 = vmatpush1.msra.mxu0 %v75_v5  ;;  %385 = vmatpush1.msra.mxu1 %v75_v5  ;;  %v84_v28 = vld [vmem:[%s875_s1 + $0xa0] sm:$0xff]  ;;  %v83_v29 = vld [vmem:[%s875_s1 + $0x98] sm:$0xff]  ;;  %v82_v30 = vld [vmem:[%s875_s1 + $0x90] sm:$0xff] }
   0xb   :  { %113 = vmatprep.subr.mxu0 %v414_v0  ;;  %354 = vmatprep.subr.mxu1 %v414_v0  ;;  %v81_v31 = vld [vmem:[%s875_s1 + $0x88] sm:$0xff]  ;;  %v80_v33 = vld [vmem:[%s875_s1 + $0x80] sm:$0xff]  ;;  %v41_v35 = vld [vmem:[%s876_s0 + $0xd8] sm:$0xff] }
   0xc   :  { %114 = vmatpush1.msra.mxu0 %v74_v6  ;;  %386 = vmatpush1.msra.mxu1 %v74_v6  ;;  %v15_v32 = vld [vmem:[%s876_s0 + $0x8] sm:$0xff]  ;;  %v14_v34 = vld [vmem:[%s876_s0] sm:$0xff]  ;;  %v17_v36 = vld [vmem:[%s876_s0 + $0x18] sm:$0xff] }
   0xd   :  { %115 = vmatprep.subr.mxu0 %v414_v0  ;;  %355 = vmatprep.subr.mxu1 %v414_v0  ;;  %v40_v37 = vld [vmem:[%s876_s0 + $0xd0] sm:$0xff]  ;;  %v43_v38 = vld [vmem:[%s876_s0 + $0xe8] sm:$0xff]  ;;  %v42_v41 = vld [vmem:[%s876_s0 + $0xe0] sm:$0xff] }
   0xe   :  { %116 = vmatpush1.msra.mxu0 %v73_v7  ;;  %387 = vmatpush1.msra.mxu1 %v73_v7  ;;  %v16_v39 = vld [vmem:[%s876_s0 + $0x10] sm:$0xff]  ;;  %v19_v40 = vld [vmem:[%s876_s0 + $0x28] sm:$0xff]  ;;  %v45_v42 = vld [vmem:[%s876_s0 + $0xf8] sm:$0xff] }
   0xf   :  { %117 = vmatprep.subr.mxu0 %v414_v0  ;;  %356 = vmatprep.subr.mxu1 %v414_v0  ;;  %v18_v43 = vld [vmem:[%s876_s0 + $0x20] sm:$0xff]  ;;  %v21_v44 = vld [vmem:[%s876_s0 + $0x38] sm:$0xff]  ;;  %v44_v45 = vld [vmem:[%s876_s0 + $0xf0] sm:$0xff] }
  0x10   :  { %118 = vmatpush1.msra.mxu0 %v72_v8  ;;  %388 = vmatpush1.msra.mxu1 %v72_v8  ;;  %v47_v46 = vld [vmem:[%s876_s0 + $0x108] sm:$0xff]  ;;  %v20_v47 = vld [vmem:[%s876_s0 + $0x30] sm:$0xff]  ;;  %v46_v49 = vld [vmem:[%s876_s0 + $0x100] sm:$0xff] }
  0x11   :  { %119 = vmatprep.subr.mxu0 %v414_v0  ;;  %357 = vmatprep.subr.mxu1 %v414_v0  ;;  %v23_v48 = vld [vmem:[%s876_s0 + $0x48] sm:$0xff]  ;;  %v49_v50 = vld [vmem:[%s876_s0 + $0x118] sm:$0xff]  ;;  %v22_v51 = vld [vmem:[%s876_s0 + $0x40] sm:$0xff] }
  0x12   :  { %120 = vmatpush1.msra.mxu0 %v71_v9  ;;  %389 = vmatpush1.msra.mxu1 %v71_v9  ;;  %v25_v52 = vld [vmem:[%s876_s0 + $0x58] sm:$0xff]  ;;  %v48_v53 = vld [vmem:[%s876_s0 + $0x110] sm:$0xff]  ;;  %v51_v54 = vld [vmem:[%s876_s0 + $0x128] sm:$0xff] }
  0x13   :  { %121 = vmatprep.subr.mxu0 %v414_v0  ;;  %358 = vmatprep.subr.mxu1 %v414_v0  ;;  %v24_v55 = vld [vmem:[%s876_s0 + $0x50] sm:$0xff]  ;;  %v27_v56 = vld [vmem:[%s876_s0 + $0x68] sm:$0xff]  ;;  %v50_v57 = vld [vmem:[%s876_s0 + $0x120] sm:$0xff] }
  0x14   :  { %122 = vmatpush1.msra.mxu0 %v70_v10  ;;  %390 = vmatpush1.msra.mxu1 %v70_v10  ;;  %v53_v58 = vld [vmem:[%s876_s0 + $0x138] sm:$0xff]  ;;  %v26_v59 = vld [vmem:[%s876_s0 + $0x60] sm:$0xff]  ;;  %v52_v61 = vld [vmem:[%s876_s0 + $0x130] sm:$0xff] }
  0x15   :  { %123 = vmatprep.subr.mxu0 %v414_v0  ;;  %359 = vmatprep.subr.mxu1 %v414_v0  ;;  %v29_v60 = vld [vmem:[%s876_s0 + $0x78] sm:$0xff]  ;;  %v55_v62 = vld [vmem:[%s876_s0 + $0x148] sm:$0xff]  ;;  %v28_v63 = vld [vmem:[%s876_s0 + $0x70] sm:$0xff] }
  0x16   :  { %124 = vmatpush1.msra.mxu0 %v69_v11  ;;  %391 = vmatpush1.msra.mxu1 %v69_v11  ;;  %v54_v1 = vld [vmem:[%s876_s0 + $0x140] sm:$0xff]  ;;  %v57_v2 = vld [vmem:[%s876_s0 + $0x158] sm:$0xff]  ;;  %v56_v5 = vld [vmem:[%s876_s0 + $0x150] sm:$0xff] }
  0x17   :  { %125 = vmatprep.subr.mxu0 %v414_v0  ;;  %360 = vmatprep.subr.mxu1 %v414_v0  ;;  %v30_v3 = vld [vmem:[%s876_s0 + $0x80] sm:$0xff]  ;;  %v33_v4 = vld [vmem:[%s876_s0 + $0x98] sm:$0xff]  ;;  %v59_v6 = vld [vmem:[%s876_s0 + $0x168] sm:$0xff] }
  0x18   :  { %126 = vmatpush1.msra.mxu0 %v68_v12  ;;  %392 = vmatpush1.msra.mxu1 %v68_v12  ;;  %v32_v7 = vld [vmem:[%s876_s0 + $0x90] sm:$0xff]  ;;  %v35_v8 = vld [vmem:[%s876_s0 + $0xa8] sm:$0xff]  ;;  %v58_v9 = vld [vmem:[%s876_s0 + $0x160] sm:$0xff] }
  0x19   :  { %127 = vmatprep.subr.mxu0 %v414_v0  ;;  %361 = vmatprep.subr.mxu1 %v414_v0  ;;  %v61_v10 = vld [vmem:[%s876_s0 + $0x178] sm:$0xff]  ;;  %v34_v11 = vld [vmem:[%s876_s0 + $0xa0] sm:$0xff] }
  0x1a   :  { %128 = vmatpush1.msra.mxu0 %v67_v13  ;;  %393 = vmatpush1.msra.mxu1 %v67_v13  ;;  %v37_v12 = vld [vmem:[%s876_s0 + $0xb8] sm:$0xff]  ;;  %v60_v13 = vld [vmem:[%s876_s0 + $0x170] sm:$0xff] }
  0x1b   :  { %129 = vmatprep.subr.mxu0 %v414_v0  ;;  %362 = vmatprep.subr.mxu1 %v414_v0 }
  0x1c   :  { %130 = vmatpush1.msra.mxu0 %v66_v14  ;;  %394 = vmatpush1.msra.mxu1 %v66_v14  ;;  %v63_v14 = vld [vmem:[%s876_s0 + $0x188] sm:$0xff] }
  0x1d   :  { %131 = vmatprep.subr.mxu0 %v414_v0  ;;  %363 = vmatprep.subr.mxu1 %v414_v0 }
  0x1e   :  { %132 = vmatpush1.msra.mxu0 %v65_v15  ;;  %395 = vmatpush1.msra.mxu1 %v65_v15  ;;  %v36_v15 = vld [vmem:[%s876_s0 + $0xb0] sm:$0xff] }
  0x1f   :  { %133 = vmatprep.subr.mxu0 %v414_v0  ;;  %364 = vmatprep.subr.mxu1 %v414_v0 }
  0x20   :  { %134 = vmatpush1.msra.mxu0 %v64_v16  ;;  %396 = vmatpush1.msra.mxu1 %v64_v16  ;;  %v39_v16 = vld [vmem:[%s876_s0 + $0xc8] sm:$0xff] }
  0x21   :  { %135 = vmatprep.subr.mxu0 %v414_v0  ;;  %365 = vmatprep.subr.mxu1 %v414_v0 }
  0x22   :  { %136 = vmatpush2.msra.mxu0 %v95_v17  ;;  %397 = vmatpush2.msra.mxu1 %v95_v17  ;;  %v62_v17 = vld [vmem:[%s876_s0 + $0x180] sm:$0xff] }
  0x23   :  { %137 = vmatprep.subr.mxu0 %v414_v0  ;;  %366 = vmatprep.subr.mxu1 %v414_v0 }
  0x24   :  { %138 = vmatpush2.msra.mxu0 %v94_v18  ;;  %398 = vmatpush2.msra.mxu1 %v94_v18  ;;  %v38_v18 = vld [vmem:[%s876_s0 + $0xc0] sm:$0xff] }
  0x25   :  { %139 = vmatprep.subr.mxu0 %v414_v0  ;;  %367 = vmatprep.subr.mxu1 %v414_v0 }
  0x26   :  { %140 = vmatpush2.msra.mxu0 %v93_v19  ;;  %399 = vmatpush2.msra.mxu1 %v93_v19  ;;  %v748_v19 = vld [vmem:[%s877_s2] ss:$0 sm:$0xff] }
  0x27   :  { %141 = vmatprep.subr.mxu0 %v414_v0  ;;  %368 = vmatprep.subr.mxu1 %v414_v0 }
  0x28   :  { %142 = vmatpush2.msra.mxu0 %v92_v20  ;;  %400 = vmatpush2.msra.mxu1 %v92_v20 }
  0x29   :  { %143 = vmatprep.subr.mxu0 %v414_v0  ;;  %369 = vmatprep.subr.mxu1 %v414_v0 }
  0x2a   :  { %144 = vmatpush2.msra.mxu0 %v91_v21  ;;  %401 = vmatpush2.msra.mxu1 %v91_v21 }
  0x2b   :  { %145 = vmatprep.subr.mxu0 %v414_v0  ;;  %370 = vmatprep.subr.mxu1 %v414_v0 }
  0x2c   :  { %146 = vmatpush2.msra.mxu0 %v90_v22  ;;  %402 = vmatpush2.msra.mxu1 %v90_v22 }
  0x2d   :  { %147 = vmatprep.subr.mxu0 %v414_v0  ;;  %371 = vmatprep.subr.mxu1 %v414_v0 }
  0x2e   :  { %148 = vmatpush2.msra.mxu0 %v89_v23  ;;  %403 = vmatpush2.msra.mxu1 %v89_v23 }
  0x2f   :  { %149 = vmatprep.subr.mxu0 %v414_v0  ;;  %372 = vmatprep.subr.mxu1 %v414_v0 }
  0x30   :  { %150 = vmatpush2.msra.mxu0 %v88_v24  ;;  %404 = vmatpush2.msra.mxu1 %v88_v24 }
  0x31   :  { %151 = vmatprep.subr.mxu0 %v414_v0  ;;  %373 = vmatprep.subr.mxu1 %v414_v0 }
  0x32   :  { %152 = vmatpush2.msra.mxu0 %v87_v25  ;;  %405 = vmatpush2.msra.mxu1 %v87_v25 }
  0x33   :  { %153 = vmatprep.subr.mxu0 %v414_v0  ;;  %374 = vmatprep.subr.mxu1 %v414_v0 }
  0x34   :  { %154 = vmatpush2.msra.mxu0 %v86_v26  ;;  %406 = vmatpush2.msra.mxu1 %v86_v26 }
  0x35   :  { %155 = vmatprep.subr.mxu0 %v414_v0  ;;  %375 = vmatprep.subr.mxu1 %v414_v0 }
  0x36   :  { %156 = vmatpush2.msra.mxu0 %v85_v27  ;;  %407 = vmatpush2.msra.mxu1 %v85_v27 }
  0x37   :  { %157 = vmatprep.subr.mxu0 %v414_v0  ;;  %376 = vmatprep.subr.mxu1 %v414_v0 }
  0x38   :  { %158 = vmatpush2.msra.mxu0 %v84_v28  ;;  %408 = vmatpush2.msra.mxu1 %v84_v28 }
  0x39   :  { %159 = vmatprep.subr.mxu0 %v414_v0  ;;  %377 = vmatprep.subr.mxu1 %v414_v0 }
  0x3a   :  { %160 = vmatpush2.msra.mxu0 %v83_v29  ;;  %409 = vmatpush2.msra.mxu1 %v83_v29 }
  0x3b   :  { %161 = vmatprep.subr.mxu0 %v414_v0  ;;  %378 = vmatprep.subr.mxu1 %v414_v0 }
  0x3c   :  { %162 = vmatpush2.msra.mxu0 %v82_v30  ;;  %410 = vmatpush2.msra.mxu1 %v82_v30 }
  0x3d   :  { %163 = vmatprep.subr.mxu0 %v414_v0  ;;  %379 = vmatprep.subr.mxu1 %v414_v0 }
  0x3e   :  { %164 = vmatpush2.msra.mxu0 %v81_v31  ;;  %411 = vmatpush2.msra.mxu1 %v81_v31 }
  0x3f   :  { %165 = vmatprep.subr.mxu0 %v414_v0  ;;  %167 = vmatprep.mubr.f32.mxu0 %v15_v32 }
  0x40   :  { %166 = vmatpush2.msra.mxu0 %v80_v33  ;;  %380 = vmatprep.subr.mxu1 %v414_v0  ;;  %v31_v0 = vld [vmem:[%s876_s0 + $0x88] sm:$0xff] }
  0x41   :  { %168 = vmatmul.mubr.f32.vlgmr.msra.gmra.mxu0 %v14_v34  ;;  %412 = vmatpush2.msra.mxu1 %v80_v33 }
  0x42   :  { %232 = vmatprep.mubr.f32.mxu1 %v41_v35  ;;  %172 = vmatprep.mubr.f32.mxu0 %v17_v36 }
  0x43   :  { %233 = vmatmul.mubr.f32.vlgmr.msra.gmra.mxu1 %v40_v37 }
  0x44   :  { %237 = vmatprep.mubr.f32.mxu1 %v43_v38 }
  0x45   :  { %173 = vmatmul.mubr.f32.gmra.mxu0 %v16_v39 }
  0x46   :  { %177 = vmatprep.mubr.f32.mxu0 %v19_v40 }
  0x47   :  { %238 = vmatmul.mubr.f32.gmra.mxu1 %v42_v41 }
  0x48   :  { %242 = vmatprep.mubr.f32.mxu1 %v45_v42 }
  0x49   :  { %178 = vmatmul.mubr.f32.gmra.mxu0 %v18_v43 }
  0x4a   :  { %182 = vmatprep.mubr.f32.mxu0 %v21_v44 }
  0x4b   :  { %243 = vmatmul.mubr.f32.gmra.mxu1 %v44_v45 }
  0x4c   :  { %247 = vmatprep.mubr.f32.mxu1 %v47_v46 }
  0x4d   :  { %183 = vmatmul.mubr.f32.gmra.mxu0 %v20_v47 }
  0x4e   :  { %187 = vmatprep.mubr.f32.mxu0 %v23_v48 }
  0x4f   :  { %248 = vmatmul.mubr.f32.gmra.mxu1 %v46_v49 }
  0x50   :  { %252 = vmatprep.mubr.f32.mxu1 %v49_v50 }
  0x51   :  { %188 = vmatmul.mubr.f32.gmra.mxu0 %v22_v51 }
  0x52   :  { %192 = vmatprep.mubr.f32.mxu0 %v25_v52 }
  0x53   :  { %253 = vmatmul.mubr.f32.gmra.mxu1 %v48_v53 }
  0x54   :  { %257 = vmatprep.mubr.f32.mxu1 %v51_v54 }
  0x55   :  { %193 = vmatmul.mubr.f32.gmra.mxu0 %v24_v55 }
  0x56   :  { %197 = vmatprep.mubr.f32.mxu0 %v27_v56 }
  0x57   :  { %258 = vmatmul.mubr.f32.gmra.mxu1 %v50_v57 }
  0x58   :  { %262 = vmatprep.mubr.f32.mxu1 %v53_v58 }
  0x59   :  { %198 = vmatmul.mubr.f32.gmra.mxu0 %v26_v59 }
  0x5a   :  { %202 = vmatprep.mubr.f32.mxu0 %v29_v60 }
  0x5b   :  { %263 = vmatmul.mubr.f32.gmra.mxu1 %v52_v61 }
  0x5c   :  { %267 = vmatprep.mubr.f32.mxu1 %v55_v62 }
  0x5d   :  { %203 = vmatmul.mubr.f32.gmra.mxu0 %v28_v63 }
  0x5e   :  { %207 = vmatprep.mubr.f32.mxu0 %v31_v0 }
  0x5f   :  { %268 = vmatmul.mubr.f32.gmra.mxu1 %v54_v1 }
  0x60   :  { %272 = vmatprep.mubr.f32.mxu1 %v57_v2 }
  0x61   :  { %208 = vmatmul.mubr.f32.gmra.mxu0 %v30_v3 }
  0x62   :  { %212 = vmatprep.mubr.f32.mxu0 %v33_v4 }
  0x63   :  { %273 = vmatmul.mubr.f32.gmra.mxu1 %v56_v5 }
  0x64   :  { %277 = vmatprep.mubr.f32.mxu1 %v59_v6 }
  0x65   :  { %213 = vmatmul.mubr.f32.gmra.mxu0 %v32_v7 }
  0x66   :  { %217 = vmatprep.mubr.f32.mxu0 %v35_v8 }
  0x67   :  { %278 = vmatmul.mubr.f32.gmra.mxu1 %v58_v9 }
  0x68   :  { %282 = vmatprep.mubr.f32.mxu1 %v61_v10 }
  0x69   :  { %218 = vmatmul.mubr.f32.gmra.mxu0 %v34_v11 }
  0x6a   :  { %222 = vmatprep.mubr.f32.mxu0 %v37_v12 }
  0x6b   :  { %283 = vmatmul.mubr.f32.gmra.mxu1 %v60_v13 }
  0x6c   :  { %287 = vmatprep.mubr.f32.mxu1 %v63_v14 }
  0x6d   :  { %223 = vmatmul.mubr.f32.gmra.mxu0 %v36_v15 }
  0x6e   :  { %227 = vmatprep.mubr.f32.mxu0 %v39_v16 }
  0x6f   :  { %288 = vmatmul.mubr.f32.gmra.mxu1 %v62_v17 }
  0x71   :  { %228 = vmatmul.mubr.f32.gmra.mxu0 %v38_v18 }
 0x101   :  { %v169_v20 = vpop.f32.mrf.mxu0 }
 0x102   :  { %v170_v21 = vadd.f32 %v748_v19, %v169_v20 }
 0x103   :  { %v171_v22 = vpop.f32.mrf.mxu0  ;;  %v234_v23 = vpop.f32.mrf.mxu1 }
 0x104   :  { %v293_v24 = vmax.f32 %v170_v21, 0.0  ;;  %v235_v25 = vadd.f32 %v748_v19, %v234_v23 }
 0x105   :  { %v174_v26 = vpop.f32.mrf.mxu0  ;;  %v236_v27 = vpop.f32.mrf.mxu1 }
 0x106   :  { %319 = vst.msk [vmem:[%s878_s3] sm:$0xff] %vm318_vm0, %v293_v24  ;;  %v306_v28 = vmax.f32 %v235_v25, 0.0  ;;  %v175_v29 = vadd.f32 %v748_v19, %v174_v26 }
 0x107   :  { %v176_v30 = vpop.f32.mrf.mxu0  ;;  %v239_v31 = vpop.f32.mrf.mxu1 }
 0x108   :  { %332 = vst.msk [vmem:[%s878_s3 + $0x68] sm:$0xff] %vm318_vm0, %v306_v28  ;;  %v294_v32 = vmax.f32 %v175_v29, 0.0  ;;  %v240_v33 = vadd.f32 %v748_v19, %v239_v31 }
 0x109   :  { %v179_v34 = vpop.f32.mrf.mxu0  ;;  %v241_v35 = vpop.f32.mrf.mxu1 }
 0x10a   :  { %320 = vst.msk [vmem:[%s878_s3 + $0x8] sm:$0xff] %vm318_vm0, %v294_v32  ;;  %v307_v36 = vmax.f32 %v240_v33, 0.0  ;;  %v180_v37 = vadd.f32 %v748_v19, %v179_v34 }
 0x10b   :  { %v181_v38 = vpop.f32.mrf.mxu0  ;;  %v244_v39 = vpop.f32.mrf.mxu1 }
 0x10c   :  { %333 = vst.msk [vmem:[%s878_s3 + $0x70] sm:$0xff] %vm318_vm0, %v307_v36  ;;  %v295_v40 = vmax.f32 %v180_v37, 0.0  ;;  %v245_v41 = vadd.f32 %v748_v19, %v244_v39 }
 0x10d   :  { %v184_v42 = vpop.f32.mrf.mxu0  ;;  %v246_v43 = vpop.f32.mrf.mxu1 }
 0x10e   :  { %321 = vst.msk [vmem:[%s878_s3 + $0x10] sm:$0xff] %vm318_vm0, %v295_v40  ;;  %v308_v44 = vmax.f32 %v245_v41, 0.0  ;;  %v185_v45 = vadd.f32 %v748_v19, %v184_v42 }
 0x10f   :  { %v186_v46 = vpop.f32.mrf.mxu0  ;;  %v249_v47 = vpop.f32.mrf.mxu1 }
 0x110   :  { %334 = vst.msk [vmem:[%s878_s3 + $0x78] sm:$0xff] %vm318_vm0, %v308_v44  ;;  %v296_v48 = vmax.f32 %v185_v45, 0.0  ;;  %v250_v49 = vadd.f32 %v748_v19, %v249_v47 }
 0x111   :  { %v189_v50 = vpop.f32.mrf.mxu0  ;;  %v251_v51 = vpop.f32.mrf.mxu1 }
 0x112   :  { %322 = vst.msk [vmem:[%s878_s3 + $0x18] sm:$0xff] %vm318_vm0, %v296_v48  ;;  %v309_v52 = vmax.f32 %v250_v49, 0.0  ;;  %v190_v53 = vadd.f32 %v748_v19, %v189_v50 }
 0x113   :  { %v191_v54 = vpop.f32.mrf.mxu0  ;;  %v254_v55 = vpop.f32.mrf.mxu1 }
 0x114   :  { %335 = vst.msk [vmem:[%s878_s3 + $0x80] sm:$0xff] %vm318_vm0, %v309_v52  ;;  %v297_v56 = vmax.f32 %v190_v53, 0.0  ;;  %v255_v57 = vadd.f32 %v748_v19, %v254_v55 }
 0x115   :  { %v194_v58 = vpop.f32.mrf.mxu0  ;;  %v256_v59 = vpop.f32.mrf.mxu1 }
 0x116   :  { %323 = vst.msk [vmem:[%s878_s3 + $0x20] sm:$0xff] %vm318_vm0, %v297_v56  ;;  %v310_v60 = vmax.f32 %v255_v57, 0.0  ;;  %v195_v61 = vadd.f32 %v748_v19, %v194_v58 }
 0x117   :  { %v196_v62 = vpop.f32.mrf.mxu0  ;;  %v259_v63 = vpop.f32.mrf.mxu1 }
 0x118   :  { %336 = vst.msk [vmem:[%s878_s3 + $0x88] sm:$0xff] %vm318_vm0, %v310_v60  ;;  %v298_v0 = vmax.f32 %v195_v61, 0.0  ;;  %v260_v1 = vadd.f32 %v748_v19, %v259_v63 }
 0x119   :  { %v199_v2 = vpop.f32.mrf.mxu0  ;;  %v261_v3 = vpop.f32.mrf.mxu1 }
 0x11a   :  { %324 = vst.msk [vmem:[%s878_s3 + $0x28] sm:$0xff] %vm318_vm0, %v298_v0  ;;  %v311_v4 = vmax.f32 %v260_v1, 0.0  ;;  %v200_v5 = vadd.f32 %v748_v19, %v199_v2 }
 0x11b   :  { %v201_v6 = vpop.f32.mrf.mxu0  ;;  %v264_v7 = vpop.f32.mrf.mxu1 }
 0x11c   :  { %337 = vst.msk [vmem:[%s878_s3 + $0x90] sm:$0xff] %vm318_vm0, %v311_v4  ;;  %v299_v8 = vmax.f32 %v200_v5, 0.0  ;;  %v265_v9 = vadd.f32 %v748_v19, %v264_v7 }
 0x11d   :  { %v204_v10 = vpop.f32.mrf.mxu0  ;;  %v266_v11 = vpop.f32.mrf.mxu1 }
 0x11e   :  { %325 = vst.msk [vmem:[%s878_s3 + $0x30] sm:$0xff] %vm318_vm0, %v299_v8  ;;  %v312_v12 = vmax.f32 %v265_v9, 0.0  ;;  %v205_v13 = vadd.f32 %v748_v19, %v204_v10 }
 0x11f   :  { %v206_v14 = vpop.f32.mrf.mxu0  ;;  %v269_v15 = vpop.f32.mrf.mxu1 }
 0x120   :  { %338 = vst.msk [vmem:[%s878_s3 + $0x98] sm:$0xff] %vm318_vm0, %v312_v12  ;;  %v300_v16 = vmax.f32 %v205_v13, 0.0  ;;  %v270_v17 = vadd.f32 %v748_v19, %v269_v15 }
 0x121   :  { %v209_v18 = vpop.f32.mrf.mxu0  ;;  %v271_v20 = vpop.f32.mrf.mxu1 }
 0x122   :  { %326 = vst.msk [vmem:[%s878_s3 + $0x38] sm:$0xff] %vm318_vm0, %v300_v16  ;;  %v313_v21 = vmax.f32 %v270_v17, 0.0  ;;  %v210_v22 = vadd.f32 %v748_v19, %v209_v18 }
 0x123   :  { %v211_v23 = vpop.f32.mrf.mxu0  ;;  %v274_v24 = vpop.f32.mrf.mxu1 }
 0x124   :  { %339 = vst.msk [vmem:[%s878_s3 + $0xa0] sm:$0xff] %vm318_vm0, %v313_v21  ;;  %v301_v25 = vmax.f32 %v210_v22, 0.0  ;;  %v275_v26 = vadd.f32 %v748_v19, %v274_v24 }
 0x125   :  { %v214_v27 = vpop.f32.mrf.mxu0  ;;  %v276_v28 = vpop.f32.mrf.mxu1 }
 0x126   :  { %327 = vst.msk [vmem:[%s878_s3 + $0x40] sm:$0xff] %vm318_vm0, %v301_v25  ;;  %v314_v29 = vmax.f32 %v275_v26, 0.0  ;;  %v215_v30 = vadd.f32 %v748_v19, %v214_v27 }
 0x127   :  { %v216_v31 = vpop.f32.mrf.mxu0  ;;  %v279_v32 = vpop.f32.mrf.mxu1 }
 0x128   :  { %340 = vst.msk [vmem:[%s878_s3 + $0xa8] sm:$0xff] %vm318_vm0, %v314_v29  ;;  %v302_v33 = vmax.f32 %v215_v30, 0.0  ;;  %v280_v34 = vadd.f32 %v748_v19, %v279_v32 }
 0x129   :  { %v219_v35 = vpop.f32.mrf.mxu0  ;;  %v281_v36 = vpop.f32.mrf.mxu1 }
 0x12a   :  { %328 = vst.msk [vmem:[%s878_s3 + $0x48] sm:$0xff] %vm318_vm0, %v302_v33  ;;  %v315_v37 = vmax.f32 %v280_v34, 0.0  ;;  %v220_v38 = vadd.f32 %v748_v19, %v219_v35 }
 0x12b   :  { %v221_v39 = vpop.f32.mrf.mxu0  ;;  %v284_v40 = vpop.f32.mrf.mxu1 }
 0x12c   :  { %341 = vst.msk [vmem:[%s878_s3 + $0xb0] sm:$0xff] %vm318_vm0, %v315_v37  ;;  %v303_v41 = vmax.f32 %v220_v38, 0.0  ;;  %v285_v42 = vadd.f32 %v748_v19, %v284_v40 }
 0x12d   :  { %v224_v43 = vpop.f32.mrf.mxu0  ;;  %v286_v44 = vpop.f32.mrf.mxu1 }
 0x12e   :  { %329 = vst.msk [vmem:[%s878_s3 + $0x50] sm:$0xff] %vm318_vm0, %v303_v41  ;;  %v316_v45 = vmax.f32 %v285_v42, 0.0  ;;  %v225_v46 = vadd.f32 %v748_v19, %v224_v43 }
 0x12f   :  { %v226_v47 = vpop.f32.mrf.mxu0  ;;  %v289_v48 = vpop.f32.mrf.mxu1 }
 0x130   :  { %342 = vst.msk [vmem:[%s878_s3 + $0xb8] sm:$0xff] %vm318_vm0, %v316_v45  ;;  %v304_v49 = vmax.f32 %v225_v46, 0.0  ;;  %v290_v50 = vadd.f32 %v748_v19, %v289_v48 }
 0x131   :  { %v229_v51 = vpop.f32.mrf.mxu0  ;;  %v291_v52 = vpop.f32.mrf.mxu1 }
 0x132   :  { %330 = vst.msk [vmem:[%s878_s3 + $0x58] sm:$0xff] %vm318_vm0, %v304_v49  ;;  %v317_v53 = vmax.f32 %v290_v50, 0.0  ;;  %v230_v54 = vadd.f32 %v748_v19, %v229_v51 }
 0x133   :  { %v231_v55 = vpop.f32.mrf.mxu0 }
 0x134   :  { %343 = vst.msk [vmem:[%s878_s3 + $0xc0] sm:$0xff] %vm318_vm0, %v317_v53  ;;  %v305_v56 = vmax.f32 %v230_v54, 0.0 }
 0x136   :  { %331 = vst.msk [vmem:[%s878_s3 + $0x60] sm:$0xff] %vm318_vm0, %v305_v56 }

// kernel: dqn_forward.5
= control target key start
LH: loop header
LB: loop body
LE: loop exit
PB: predicated region body
PF: predicated region fallthrough
CT: control target
= control target key end

     0   :  { %vm275_vm0 = vcmask 523264   ;;  %s652_s1 = inlined_call_operand.vmem [shape: f32[512,64], index: 1, kind: input, shape index: {}]   ;;  %s653_s0 = inlined_call_operand.vmem [shape: f32[32,512], index: 0, kind: input, shape index: {}]   ;;  %s654_s2 = inlined_call_operand.vmem [shape: f32[1,64], index: 2, kind: input, shape index: {}]   ;;  %s655_s3 = inlined_call_operand.vmem [shape: f32[32,64], index: 3, kind: output, shape index: {}]  }
   0x1   :  { %v61_v0 = vld [vmem:[%s652_s1 + $0xf8] sm:$0xff]  ;;  %v60_v4 = vld [vmem:[%s652_s1 + $0xf0] sm:$0xff]  ;;  %v59_v8 = vld [vmem:[%s652_s1 + $0xe8] sm:$0xff] }
   0x2   :  { %v93_v1 = vld [vmem:[%s652_s1 + $0x1f8] sm:$0xff]  ;;  %285 = vmatprep.subr.mxu0 %v61_v0  ;;  %v92_v5 = vld [vmem:[%s652_s1 + $0x1f0] sm:$0xff]  ;;  %v91_v9 = vld [vmem:[%s652_s1 + $0x1e8] sm:$0xff] }
   0x3   :  { %v45_v2 = vld [vmem:[%s652_s1 + $0x78] sm:$0xff]  ;;  %329 = vmatprep.subr.mxu1 %v93_v1  ;;  %v44_v6 = vld [vmem:[%s652_s1 + $0x70] sm:$0xff]  ;;  %v43_v10 = vld [vmem:[%s652_s1 + $0x68] sm:$0xff] }
   0x4   :  { %v77_v3 = vld [vmem:[%s652_s1 + $0x178] sm:$0xff]  ;;  %286 = vmatpush3.msra.mxu0 %v45_v2  ;;  %v76_v7 = vld [vmem:[%s652_s1 + $0x170] sm:$0xff]  ;;  %v75_v11 = vld [vmem:[%s652_s1 + $0x168] sm:$0xff] }
   0x5   :  { %330 = vmatpush3.msra.mxu1 %v77_v3  ;;  %287 = vmatprep.subr.mxu0 %v60_v4  ;;  %v58_v12 = vld [vmem:[%s652_s1 + $0xe0] sm:$0xff]  ;;  %v57_v16 = vld [vmem:[%s652_s1 + $0xd8] sm:$0xff]  ;;  %v56_v20 = vld [vmem:[%s652_s1 + $0xd0] sm:$0xff] }
   0x6   :  { %331 = vmatprep.subr.mxu1 %v92_v5  ;;  %288 = vmatpush3.msra.mxu0 %v44_v6  ;;  %v90_v13 = vld [vmem:[%s652_s1 + $0x1e0] sm:$0xff]  ;;  %v89_v17 = vld [vmem:[%s652_s1 + $0x1d8] sm:$0xff]  ;;  %v88_v21 = vld [vmem:[%s652_s1 + $0x1d0] sm:$0xff] }
   0x7   :  { %332 = vmatpush3.msra.mxu1 %v76_v7  ;;  %289 = vmatprep.subr.mxu0 %v59_v8  ;;  %v42_v14 = vld [vmem:[%s652_s1 + $0x60] sm:$0xff]  ;;  %v41_v18 = vld [vmem:[%s652_s1 + $0x58] sm:$0xff]  ;;  %v40_v22 = vld [vmem:[%s652_s1 + $0x50] sm:$0xff] }
   0x8   :  { %333 = vmatprep.subr.mxu1 %v91_v9  ;;  %v74_v15 = vld [vmem:[%s652_s1 + $0x160] sm:$0xff]  ;;  %290 = vmatpush3.msra.mxu0 %v43_v10  ;;  %v73_v19 = vld [vmem:[%s652_s1 + $0x158] sm:$0xff]  ;;  %v72_v23 = vld [vmem:[%s652_s1 + $0x150] sm:$0xff] }
   0x9   :  { %334 = vmatpush3.msra.mxu1 %v75_v11  ;;  %291 = vmatprep.subr.mxu0 %v58_v12  ;;  %v55_v24 = vld [vmem:[%s652_s1 + $0xc8] sm:$0xff]  ;;  %v54_v28 = vld [vmem:[%s652_s1 + $0xc0] sm:$0xff]  ;;  %v53_v32 = vld [vmem:[%s652_s1 + $0xb8] sm:$0xff] }
   0xa   :  { %335 = vmatprep.subr.mxu1 %v90_v13  ;;  %292 = vmatpush3.msra.mxu0 %v42_v14  ;;  %v87_v25 = vld [vmem:[%s652_s1 + $0x1c8] sm:$0xff]  ;;  %v86_v29 = vld [vmem:[%s652_s1 + $0x1c0] sm:$0xff]  ;;  %v85_v33 = vld [vmem:[%s652_s1 + $0x1b8] sm:$0xff] }
   0xb   :  { %336 = vmatpush3.msra.mxu1 %v74_v15  ;;  %293 = vmatprep.subr.mxu0 %v57_v16  ;;  %v39_v26 = vld [vmem:[%s652_s1 + $0x48] sm:$0xff]  ;;  %v38_v30 = vld [vmem:[%s652_s1 + $0x40] sm:$0xff]  ;;  %v37_v34 = vld [vmem:[%s652_s1 + $0x38] sm:$0xff] }
   0xc   :  { %337 = vmatprep.subr.mxu1 %v89_v17  ;;  %294 = vmatpush3.msra.mxu0 %v41_v18  ;;  %v71_v27 = vld [vmem:[%s652_s1 + $0x148] sm:$0xff]  ;;  %v70_v31 = vld [vmem:[%s652_s1 + $0x140] sm:$0xff]  ;;  %v69_v35 = vld [vmem:[%s652_s1 + $0x138] sm:$0xff] }
   0xd   :  { %338 = vmatpush3.msra.mxu1 %v73_v19  ;;  %295 = vmatprep.subr.mxu0 %v56_v20  ;;  %v52_v36 = vld [vmem:[%s652_s1 + $0xb0] sm:$0xff]  ;;  %v51_v40 = vld [vmem:[%s652_s1 + $0xa8] sm:$0xff]  ;;  %v50_v44 = vld [vmem:[%s652_s1 + $0xa0] sm:$0xff] }
   0xe   :  { %339 = vmatprep.subr.mxu1 %v88_v21  ;;  %296 = vmatpush3.msra.mxu0 %v40_v22  ;;  %v84_v37 = vld [vmem:[%s652_s1 + $0x1b0] sm:$0xff]  ;;  %v83_v41 = vld [vmem:[%s652_s1 + $0x1a8] sm:$0xff]  ;;  %v82_v45 = vld [vmem:[%s652_s1 + $0x1a0] sm:$0xff] }
   0xf   :  { %340 = vmatpush3.msra.mxu1 %v72_v23  ;;  %297 = vmatprep.subr.mxu0 %v55_v24  ;;  %v36_v38 = vld [vmem:[%s652_s1 + $0x30] sm:$0xff]  ;;  %v35_v42 = vld [vmem:[%s652_s1 + $0x28] sm:$0xff]  ;;  %v34_v46 = vld [vmem:[%s652_s1 + $0x20] sm:$0xff] }
  0x10   :  { %341 = vmatprep.subr.mxu1 %v87_v25  ;;  %298 = vmatpush3.msra.mxu0 %v39_v26  ;;  %v68_v39 = vld [vmem:[%s652_s1 + $0x130] sm:$0xff]  ;;  %v67_v43 = vld [vmem:[%s652_s1 + $0x128] sm:$0xff]  ;;  %v66_v47 = vld [vmem:[%s652_s1 + $0x120] sm:$0xff] }
  0x11   :  { %342 = vmatpush3.msra.mxu1 %v71_v27  ;;  %299 = vmatprep.subr.mxu0 %v54_v28  ;;  %v49_v48 = vld [vmem:[%s652_s1 + $0x98] sm:$0xff]  ;;  %v48_v52 = vld [vmem:[%s652_s1 + $0x90] sm:$0xff]  ;;  %v47_v56 = vld [vmem:[%s652_s1 + $0x88] sm:$0xff] }
  0x12   :  { %343 = vmatprep.subr.mxu1 %v86_v29  ;;  %300 = vmatpush3.msra.mxu0 %v38_v30  ;;  %v81_v49 = vld [vmem:[%s652_s1 + $0x198] sm:$0xff]  ;;  %v80_v53 = vld [vmem:[%s652_s1 + $0x190] sm:$0xff]  ;;  %v79_v57 = vld [vmem:[%s652_s1 + $0x188] sm:$0xff] }
  0x13   :  { %344 = vmatpush3.msra.mxu1 %v70_v31  ;;  %301 = vmatprep.subr.mxu0 %v53_v32  ;;  %v33_v50 = vld [vmem:[%s652_s1 + $0x18] sm:$0xff]  ;;  %v32_v54 = vld [vmem:[%s652_s1 + $0x10] sm:$0xff]  ;;  %v31_v58 = vld [vmem:[%s652_s1 + $0x8] sm:$0xff] }
  0x14   :  { %345 = vmatprep.subr.mxu1 %v85_v33  ;;  %302 = vmatpush3.msra.mxu0 %v37_v34  ;;  %v65_v51 = vld [vmem:[%s652_s1 + $0x118] sm:$0xff]  ;;  %v64_v55 = vld [vmem:[%s652_s1 + $0x110] sm:$0xff]  ;;  %v63_v59 = vld [vmem:[%s652_s1 + $0x108] sm:$0xff] }
  0x15   :  { %346 = vmatpush3.msra.mxu1 %v69_v35  ;;  %303 = vmatprep.subr.mxu0 %v52_v36  ;;  %v46_v60 = vld [vmem:[%s652_s1 + $0x80] sm:$0xff]  ;;  %v15_v63 = vld [vmem:[%s653_s0 + $0x8] sm:$0xff]  ;;  %v17_v1 = vld [vmem:[%s653_s0 + $0x18] sm:$0xff] }
  0x16   :  { %347 = vmatprep.subr.mxu1 %v84_v37  ;;  %304 = vmatpush3.msra.mxu0 %v36_v38  ;;  %v78_v61 = vld [vmem:[%s652_s1 + $0x180] sm:$0xff]  ;;  %v16_v3 = vld [vmem:[%s653_s0 + $0x10] sm:$0xff]  ;;  %v19_v4 = vld [vmem:[%s653_s0 + $0x28] sm:$0xff] }
  0x17   :  { %348 = vmatpush3.msra.mxu1 %v68_v39  ;;  %305 = vmatprep.subr.mxu0 %v51_v40  ;;  %v30_v62 = vld [vmem:[%s652_s1] sm:$0xff]  ;;  %v21_v5 = vld [vmem:[%s653_s0 + $0x38] sm:$0xff]  ;;  %v20_v7 = vld [vmem:[%s653_s0 + $0x30] sm:$0xff] }
  0x18   :  { %349 = vmatprep.subr.mxu1 %v83_v41  ;;  %306 = vmatpush3.msra.mxu0 %v35_v42  ;;  %v62_v0 = vld [vmem:[%s652_s1 + $0x100] sm:$0xff]  ;;  %v23_v8 = vld [vmem:[%s653_s0 + $0x48] sm:$0xff]  ;;  %v25_v9 = vld [vmem:[%s653_s0 + $0x58] sm:$0xff] }
  0x19   :  { %350 = vmatpush3.msra.mxu1 %v67_v43  ;;  %307 = vmatprep.subr.mxu0 %v50_v44  ;;  %v14_v2 = vld [vmem:[%s653_s0] sm:$0xff]  ;;  %v24_v11 = vld [vmem:[%s653_s0 + $0x50] sm:$0xff]  ;;  %v27_v12 = vld [vmem:[%s653_s0 + $0x68] sm:$0xff] }
  0x1a   :  { %351 = vmatprep.subr.mxu1 %v82_v45  ;;  %308 = vmatpush3.msra.mxu0 %v34_v46  ;;  %v18_v6 = vld [vmem:[%s653_s0 + $0x20] sm:$0xff]  ;;  %v29_v13 = vld [vmem:[%s653_s0 + $0x78] sm:$0xff]  ;;  %v28_v15 = vld [vmem:[%s653_s0 + $0x70] sm:$0xff] }
  0x1b   :  { %352 = vmatpush3.msra.mxu1 %v66_v47  ;;  %309 = vmatprep.subr.mxu0 %v49_v48  ;;  %v22_v10 = vld [vmem:[%s653_s0 + $0x40] sm:$0xff] }
  0x1c   :  { %353 = vmatprep.subr.mxu1 %v81_v49  ;;  %310 = vmatpush3.msra.mxu0 %v33_v50  ;;  %v26_v14 = vld [vmem:[%s653_s0 + $0x60] sm:$0xff] }
  0x1d   :  { %354 = vmatpush3.msra.mxu1 %v65_v51  ;;  %311 = vmatprep.subr.mxu0 %v48_v52  ;;  %v284_v18 = vld [vmem:[%s654_s2] ss:$0 sm:$0xff] }
  0x1e   :  { %355 = vmatprep.subr.mxu1 %v80_v53  ;;  %312 = vmatpush3.msra.mxu0 %v32_v54 }
  0x1f   :  { %356 = vmatpush3.msra.mxu1 %v64_v55  ;;  %313 = vmatprep.subr.mxu0 %v47_v56 }
  0x20   :  { %357 = vmatprep.subr.mxu1 %v79_v57  ;;  %314 = vmatpush3.msra.mxu0 %v31_v58 }
  0x21   :  { %358 = vmatpush3.msra.mxu1 %v63_v59  ;;  %315 = vmatprep.subr.mxu0 %v46_v60 }
  0x22   :  { %359 = vmatprep.subr.mxu1 %v78_v61  ;;  %316 = vmatpush3.msra.mxu0 %v30_v62 }
  0x23   :  { %165 = vmatprep.mubr.f32.mxu0 %v15_v63  ;;  %360 = vmatpush3.msra.mxu1 %v62_v0 }
  0x24   :  { %250 = vmatprep.mubr.f32.mxu1 %v17_v1  ;;  %166 = vmatmul.mubr.f32.vlgmr.msra.gmra.mxu0 %v14_v2 }
  0x25   :  { %251 = vmatmul.mubr.f32.vlgmr.msra.gmra.mxu1 %v16_v3  ;;  %170 = vmatprep.mubr.f32.mxu0 %v19_v4 }
  0x26   :  { %255 = vmatprep.mubr.f32.mxu1 %v21_v5 }
  0x28   :  { %171 = vmatmul.mubr.f32.gmra.mxu0 %v18_v6 }
  0x29   :  { %256 = vmatmul.mubr.f32.gmra.mxu1 %v20_v7  ;;  %175 = vmatprep.mubr.f32.mxu0 %v23_v8 }
  0x2a   :  { %260 = vmatprep.mubr.f32.mxu1 %v25_v9 }
  0x2c   :  { %176 = vmatmul.mubr.f32.gmra.mxu0 %v22_v10 }
  0x2d   :  { %261 = vmatmul.mubr.f32.gmra.mxu1 %v24_v11  ;;  %180 = vmatprep.mubr.f32.mxu0 %v27_v12 }
  0x2e   :  { %265 = vmatprep.mubr.f32.mxu1 %v29_v13 }
  0x30   :  { %181 = vmatmul.mubr.f32.gmra.mxu0 %v26_v14 }
  0x31   :  { %266 = vmatmul.mubr.f32.gmra.mxu1 %v28_v15 }
  0xe4   :  { %v317_v16 = vpop.f32.mrf.mxu0 }
  0xe5   :  { %v361_v17 = vpop.f32.mrf.mxu1 }
  0xe6   :  { %v318_v19 = vpop.f32.mrf.mxu0 }
  0xe7   :  { %v362_v20 = vpop.f32.mrf.mxu1  ;;  %v319_v21 = vadd.f32 %v318_v19, %v317_v16 }
  0xe8   :  { %v320_v22 = vpop.f32.mrf.mxu0  ;;  %v363_v25 = vadd.f32 %v362_v20, %v361_v17 }
  0xe9   :  { %v364_v23 = vpop.f32.mrf.mxu1  ;;  %v168_v24 = vadd.f32 %v319_v21, %v284_v18 }
  0xea   :  { %v321_v26 = vpop.f32.mrf.mxu0 }
  0xeb   :  { %v365_v27 = vpop.f32.mrf.mxu1  ;;  %v253_v28 = vadd.f32 %v363_v25, %v168_v24  ;;  %v322_v29 = vadd.f32 %v321_v26, %v320_v22 }
  0xec   :  { %v323_v30 = vpop.f32.mrf.mxu0  ;;  %v366_v34 = vadd.f32 %v365_v27, %v364_v23 }
  0xed   :  { %v367_v31 = vpop.f32.mrf.mxu1  ;;  %v271_v32 = vmax.f32 %v253_v28, 0.0  ;;  %v173_v33 = vadd.f32 %v322_v29, %v284_v18 }
  0xee   :  { %v324_v35 = vpop.f32.mrf.mxu0 }
  0xef   :  { %v368_v36 = vpop.f32.mrf.mxu1  ;;  %276 = vst.msk [vmem:[%s655_s3] sm:$0xff] %vm275_vm0, %v271_v32  ;;  %v258_v37 = vadd.f32 %v366_v34, %v173_v33  ;;  %v325_v38 = vadd.f32 %v324_v35, %v323_v30 }
  0xf0   :  { %v326_v39 = vpop.f32.mrf.mxu0  ;;  %v369_v43 = vadd.f32 %v368_v36, %v367_v31 }
  0xf1   :  { %v370_v40 = vpop.f32.mrf.mxu1  ;;  %v272_v41 = vmax.f32 %v258_v37, 0.0  ;;  %v178_v42 = vadd.f32 %v325_v38, %v284_v18 }
  0xf2   :  { %v327_v44 = vpop.f32.mrf.mxu0 }
  0xf3   :  { %v371_v45 = vpop.f32.mrf.mxu1  ;;  %277 = vst.msk [vmem:[%s655_s3 + $0x8] sm:$0xff] %vm275_vm0, %v272_v41  ;;  %v263_v46 = vadd.f32 %v369_v43, %v178_v42  ;;  %v328_v47 = vadd.f32 %v327_v44, %v326_v39 }
  0xf4   :  { %v372_v50 = vadd.f32 %v371_v45, %v370_v40 }
  0xf5   :  { %v273_v48 = vmax.f32 %v263_v46, 0.0  ;;  %v183_v49 = vadd.f32 %v328_v47, %v284_v18 }
  0xf7   :  { %278 = vst.msk [vmem:[%s655_s3 + $0x10] sm:$0xff] %vm275_vm0, %v273_v48  ;;  %v268_v51 = vadd.f32 %v372_v50, %v183_v49 }
  0xf9   :  { %v274_v52 = vmax.f32 %v268_v51, 0.0 }
  0xfb   :  { %279 = vst.msk [vmem:[%s655_s3 + $0x18] sm:$0xff] %vm275_vm0, %v274_v52 }

// kernel: dqn_forward.6
= control target key start
LH: loop header
LB: loop body
LE: loop exit
PB: predicated region body
PF: predicated region fallthrough
CT: control target
= control target key end

     0   :  { %vm421_vm0 = vmmov 0   ;;  %vm98_vm1 = vcmask 523264   ;;  %s681_s1 = inlined_call_operand.vmem [shape: f32[576,64], index: 1, kind: input, shape index: {}]   ;;  %s682_s0 = inlined_call_operand.vmem [shape: f32[8,576], index: 0, kind: input, shape index: {}]   ;;  %s683_s2 = inlined_call_operand.vmem [shape: f32[1,64], index: 2, kind: input, shape index: {}]   ;;  %s684_s3 = inlined_call_operand.vmem [shape: f32[8,64], index: 3, kind: output, shape index: {}]  }
   0x1   :  { %v50_v0 = vld [vmem:[%s681_s1 + $0xf8] sm:$0xff]  ;;  %v49_v2 = vld [vmem:[%s681_s1 + $0xf0] sm:$0xff]  ;;  %v48_v6 = vld [vmem:[%s681_s1 + $0xe8] sm:$0xff] }
   0x2   :  { %v34_v1 = vld [vmem:[%s681_s1 + $0x78] sm:$0xff]  ;;  %320 = vmatprep.subr.mxu0 %v50_v0  ;;  %v33_v4 = vld [vmem:[%s681_s1 + $0x70] sm:$0xff]  ;;  %v32_v8 = vld [vmem:[%s681_s1 + $0x68] sm:$0xff] }
   0x3   :  { %v82_v3 = vld [vmem:[%s681_s1 + $0x1f8] sm:$0xff]  ;;  %321 = vmatpush3.msra.mxu0 %v34_v1  ;;  %v81_v7 = vld [vmem:[%s681_s1 + $0x1f0] sm:$0xff]  ;;  %v80_v10 = vld [vmem:[%s681_s1 + $0x1e8] sm:$0xff] }
   0x4   :  { %v66_v5 = vld [vmem:[%s681_s1 + $0x178] sm:$0xff]  ;;  %355 = vmatprep.subr.mxu1 %v82_v3  ;;  %322 = vmatprep.subr.mxu0 %v49_v2  ;;  %v65_v9 = vld [vmem:[%s681_s1 + $0x170] sm:$0xff]  ;;  %v47_v11 = vld [vmem:[%s681_s1 + $0xe0] sm:$0xff] }
   0x5   :  { %356 = vmatpush3.msra.mxu1 %v66_v5  ;;  %323 = vmatpush3.msra.mxu0 %v33_v4  ;;  %v64_v12 = vld [vmem:[%s681_s1 + $0x168] sm:$0xff]  ;;  %v31_v13 = vld [vmem:[%s681_s1 + $0x60] sm:$0xff]  ;;  %v46_v15 = vld [vmem:[%s681_s1 + $0xd8] sm:$0xff]  ;;  %v420_v5 = vmov 0.0  }
   0x6   :  { %357 = vmatprep.subr.mxu1 %v81_v7  ;;  %324 = vmatprep.subr.mxu0 %v48_v6  ;;  %v79_v14 = vld [vmem:[%s681_s1 + $0x1e0] sm:$0xff]  ;;  %v30_v17 = vld [vmem:[%s681_s1 + $0x58] sm:$0xff]  ;;  %v45_v19 = vld [vmem:[%s681_s1 + $0xd0] sm:$0xff] }
   0x7   :  { %358 = vmatpush3.msra.mxu1 %v65_v9  ;;  %325 = vmatpush3.msra.mxu0 %v32_v8  ;;  %v63_v16 = vld [vmem:[%s681_s1 + $0x160] sm:$0xff]  ;;  %v78_v18 = vld [vmem:[%s681_s1 + $0x1d8] sm:$0xff]  ;;  %v29_v21 = vld [vmem:[%s681_s1 + $0x50] sm:$0xff] }
   0x8   :  { %359 = vmatprep.subr.mxu1 %v80_v10  ;;  %326 = vmatprep.subr.mxu0 %v47_v11  ;;  %v62_v20 = vld [vmem:[%s681_s1 + $0x158] sm:$0xff]  ;;  %v77_v22 = vld [vmem:[%s681_s1 + $0x1d0] sm:$0xff]  ;;  %v44_v23 = vld [vmem:[%s681_s1 + $0xc8] sm:$0xff] }
   0x9   :  { %360 = vmatpush3.msra.mxu1 %v64_v12  ;;  %327 = vmatpush3.msra.mxu0 %v31_v13  ;;  %v61_v24 = vld [vmem:[%s681_s1 + $0x150] sm:$0xff]  ;;  %v28_v25 = vld [vmem:[%s681_s1 + $0x48] sm:$0xff]  ;;  %v43_v27 = vld [vmem:[%s681_s1 + $0xc0] sm:$0xff] }
   0xa   :  { %361 = vmatprep.subr.mxu1 %v79_v14  ;;  %328 = vmatprep.subr.mxu0 %v46_v15  ;;  %v76_v26 = vld [vmem:[%s681_s1 + $0x1c8] sm:$0xff]  ;;  %v27_v29 = vld [vmem:[%s681_s1 + $0x40] sm:$0xff]  ;;  %v42_v31 = vld [vmem:[%s681_s1 + $0xb8] sm:$0xff] }
   0xb   :  { %362 = vmatpush3.msra.mxu1 %v63_v16  ;;  %329 = vmatpush3.msra.mxu0 %v30_v17  ;;  %v60_v28 = vld [vmem:[%s681_s1 + $0x148] sm:$0xff]  ;;  %v75_v30 = vld [vmem:[%s681_s1 + $0x1c0] sm:$0xff]  ;;  %v26_v33 = vld [vmem:[%s681_s1 + $0x38] sm:$0xff] }
   0xc   :  { %363 = vmatprep.subr.mxu1 %v78_v18  ;;  %330 = vmatprep.subr.mxu0 %v45_v19  ;;  %v59_v32 = vld [vmem:[%s681_s1 + $0x140] sm:$0xff]  ;;  %v74_v34 = vld [vmem:[%s681_s1 + $0x1b8] sm:$0xff]  ;;  %v41_v35 = vld [vmem:[%s681_s1 + $0xb0] sm:$0xff] }
   0xd   :  { %364 = vmatpush3.msra.mxu1 %v62_v20  ;;  %331 = vmatpush3.msra.mxu0 %v29_v21  ;;  %v58_v36 = vld [vmem:[%s681_s1 + $0x138] sm:$0xff]  ;;  %v25_v37 = vld [vmem:[%s681_s1 + $0x30] sm:$0xff]  ;;  %v40_v39 = vld [vmem:[%s681_s1 + $0xa8] sm:$0xff] }
   0xe   :  { %365 = vmatprep.subr.mxu1 %v77_v22  ;;  %332 = vmatprep.subr.mxu0 %v44_v23  ;;  %v73_v38 = vld [vmem:[%s681_s1 + $0x1b0] sm:$0xff]  ;;  %v24_v41 = vld [vmem:[%s681_s1 + $0x28] sm:$0xff]  ;;  %v39_v43 = vld [vmem:[%s681_s1 + $0xa0] sm:$0xff] }
   0xf   :  { %366 = vmatpush3.msra.mxu1 %v61_v24  ;;  %333 = vmatpush3.msra.mxu0 %v28_v25  ;;  %v57_v40 = vld [vmem:[%s681_s1 + $0x130] sm:$0xff]  ;;  %v72_v42 = vld [vmem:[%s681_s1 + $0x1a8] sm:$0xff]  ;;  %v23_v45 = vld [vmem:[%s681_s1 + $0x20] sm:$0xff] }
  0x10   :  { %367 = vmatprep.subr.mxu1 %v76_v26  ;;  %334 = vmatprep.subr.mxu0 %v43_v27  ;;  %v56_v44 = vld [vmem:[%s681_s1 + $0x128] sm:$0xff]  ;;  %v71_v46 = vld [vmem:[%s681_s1 + $0x1a0] sm:$0xff]  ;;  %v38_v47 = vld [vmem:[%s681_s1 + $0x98] sm:$0xff] }
  0x11   :  { %368 = vmatpush3.msra.mxu1 %v60_v28  ;;  %335 = vmatpush3.msra.mxu0 %v27_v29  ;;  %v55_v48 = vld [vmem:[%s681_s1 + $0x120] sm:$0xff]  ;;  %v22_v49 = vld [vmem:[%s681_s1 + $0x18] sm:$0xff]  ;;  %v37_v51 = vld [vmem:[%s681_s1 + $0x90] sm:$0xff] }
  0x12   :  { %369 = vmatprep.subr.mxu1 %v75_v30  ;;  %336 = vmatprep.subr.mxu0 %v42_v31  ;;  %v70_v50 = vld [vmem:[%s681_s1 + $0x198] sm:$0xff]  ;;  %v21_v53 = vld [vmem:[%s681_s1 + $0x10] sm:$0xff]  ;;  %v36_v55 = vld [vmem:[%s681_s1 + $0x88] sm:$0xff] }
  0x13   :  { %370 = vmatpush3.msra.mxu1 %v59_v32  ;;  %337 = vmatpush3.msra.mxu0 %v26_v33  ;;  %v54_v52 = vld [vmem:[%s681_s1 + $0x118] sm:$0xff]  ;;  %v69_v54 = vld [vmem:[%s681_s1 + $0x190] sm:$0xff]  ;;  %v20_v57 = vld [vmem:[%s681_s1 + $0x8] sm:$0xff] }
  0x14   :  { %371 = vmatprep.subr.mxu1 %v74_v34  ;;  %338 = vmatprep.subr.mxu0 %v41_v35  ;;  %v53_v56 = vld [vmem:[%s681_s1 + $0x110] sm:$0xff]  ;;  %v68_v58 = vld [vmem:[%s681_s1 + $0x188] sm:$0xff]  ;;  %v35_v59 = vld [vmem:[%s681_s1 + $0x80] sm:$0xff] }
  0x15   :  { %372 = vmatpush3.msra.mxu1 %v58_v36  ;;  %339 = vmatpush3.msra.mxu0 %v25_v37  ;;  %v15_v60 = vld [vmem:[%s682_s0 + $0x8] sm:$0xff]  ;;  %v19_v61 = vld [vmem:[%s681_s1] sm:$0xff]  ;;  %v17_v2 = vld [vmem:[%s682_s0 + $0x18] sm:$0xff] }
  0x16   :  { %373 = vmatprep.subr.mxu1 %v73_v38  ;;  %340 = vmatprep.subr.mxu0 %v40_v39  ;;  %v52_v62 = vld [vmem:[%s681_s1 + $0x108] sm:$0xff]  ;;  %v14_v63 = vld [vmem:[%s682_s0] sm:$0xff]  ;;  %v90_v3 = vld [vmem:[%s681_s1 + $0x238] sm:$0xff] }
  0x17   :  { %374 = vmatpush3.msra.mxu1 %v57_v40  ;;  %341 = vmatpush3.msra.mxu0 %v24_v41  ;;  %v67_v0 = vld [vmem:[%s681_s1 + $0x180] sm:$0xff]  ;;  %v16_v4 = vld [vmem:[%s682_s0 + $0x10] sm:$0xff]  ;;  %v88_v7 = vld [vmem:[%s681_s1 + $0x228] sm:$0xff] }
  0x18   :  { %375 = vmatprep.subr.mxu1 %v72_v42  ;;  %342 = vmatprep.subr.mxu0 %v39_v43  ;;  %v51_v1 = vld [vmem:[%s681_s1 + $0x100] sm:$0xff]  ;;  %v89_v6 = vld [vmem:[%s681_s1 + $0x230] sm:$0xff]  ;;  %v86_v9 = vld [vmem:[%s681_s1 + $0x218] sm:$0xff] }
  0x19   :  { %376 = vmatpush3.msra.mxu1 %v56_v44  ;;  %343 = vmatpush3.msra.mxu0 %v23_v45  ;;  %v87_v8 = vld [vmem:[%s681_s1 + $0x220] sm:$0xff]  ;;  %v85_v10 = vld [vmem:[%s681_s1 + $0x210] sm:$0xff]  ;;  %v84_v11 = vld [vmem:[%s681_s1 + $0x208] sm:$0xff] }
  0x1a   :  { %377 = vmatprep.subr.mxu1 %v71_v46  ;;  %344 = vmatprep.subr.mxu0 %v38_v47  ;;  %v83_v12 = vld [vmem:[%s681_s1 + $0x200] sm:$0xff] }
  0x1b   :  { %378 = vmatpush3.msra.mxu1 %v55_v48  ;;  %345 = vmatpush3.msra.mxu0 %v22_v49  ;;  %v18_v13 = vld [vmem:[%s682_s0 + $0x20] sm:$0xff] }
  0x1c   :  { %379 = vmatprep.subr.mxu1 %v70_v50  ;;  %346 = vmatprep.subr.mxu0 %v37_v51  ;;  %v318_v18 = vld [vmem:[%s683_s2] ss:$0 sm:$0xff] }
  0x1d   :  { %380 = vmatpush3.msra.mxu1 %v54_v52  ;;  %347 = vmatpush3.msra.mxu0 %v21_v53 }
  0x1e   :  { %381 = vmatprep.subr.mxu1 %v69_v54  ;;  %348 = vmatprep.subr.mxu0 %v36_v55 }
  0x1f   :  { %382 = vmatpush3.msra.mxu1 %v53_v56  ;;  %349 = vmatpush3.msra.mxu0 %v20_v57 }
  0x20   :  { %383 = vmatprep.subr.mxu1 %v68_v58  ;;  %350 = vmatprep.subr.mxu0 %v35_v59 }
  0x21   :  { %166 = vmatprep.mubr.f32.mxu0 %v15_v60  ;;  %351 = vmatpush3.msra.mxu0 %v19_v61 }
  0x22   :  { %384 = vmatpush3.msra.mxu1 %v52_v62  ;;  %167 = vmatmul.mubr.f32.vlgmr.msra.gmra.mxu0 %v14_v63 }
  0x23   :  { %385 = vmatprep.subr.mxu1 %v67_v0  ;;  %399 = vmatprep.subr.mxu0 %v420_v5 }
  0x24   :  { %386 = vmatpush3.msra.mxu1 %v51_v1  ;;  %236 = vmatprep.mubr.f32.mxu1 %v17_v2 }
  0x25   :  { %400 = vmatpush3.msra.mxu0 %v90_v3  ;;  %237 = vmatmul.mubr.f32.vlgmr.msra.gmra.mxu1 %v16_v4 }
  0x26   :  { %401 = vmatprep.subr.mxu0 %v420_v5  ;;  %415 = vmatprep.mubr.msk.f32.mxu0 %vm421_vm0, %v420_v5 }
  0x27   :  { %402 = vmatpush3.msra.mxu0 %v89_v6 }
  0x28   :  { %403 = vmatprep.subr.mxu0 %v420_v5 }
  0x29   :  { %404 = vmatpush3.msra.mxu0 %v88_v7 }
  0x2a   :  { %405 = vmatprep.subr.mxu0 %v420_v5 }
  0x2b   :  { %406 = vmatpush3.msra.mxu0 %v87_v8 }
  0x2c   :  { %407 = vmatprep.subr.mxu0 %v420_v5 }
  0x2d   :  { %408 = vmatpush3.msra.mxu0 %v86_v9 }
  0x2e   :  { %409 = vmatprep.subr.mxu0 %v420_v5 }
  0x2f   :  { %410 = vmatpush3.msra.mxu0 %v85_v10 }
  0x30   :  { %411 = vmatprep.subr.mxu0 %v420_v5 }
  0x31   :  { %412 = vmatpush3.msra.mxu0 %v84_v11 }
  0x32   :  { %413 = vmatprep.subr.mxu0 %v420_v5 }
  0x33   :  { %414 = vmatpush3.msra.mxu0 %v83_v12 }
  0x34   :  { %416 = vmatmul.mubr.msk.f32.vlgmr.msra.gmra.mxu0 %vm98_vm1, %v18_v13 }
  0xe2   :  { %v352_v14 = vpop.f32.mrf.mxu0 }
  0xe4   :  { %v353_v15 = vpop.f32.mrf.mxu0 }
  0xe5   :  { %v387_v16 = vpop.f32.mrf.mxu1  ;;  %v354_v17 = vadd.f32 %v353_v15, %v352_v14 }
  0xe7   :  { %v388_v19 = vpop.f32.mrf.mxu1  ;;  %v169_v20 = vadd.f32 %v354_v17, %v318_v18 }
  0xe8   :  { %v389_v21 = vadd.f32 %v388_v19, %v387_v16 }
  0xea   :  { %v239_v22 = vadd.f32 %v389_v21, %v169_v20 }
  0xf4   :  { %v308_v23 = vpop.f32.mrf.mxu0 }
  0xf5   :  { %v309_v24 = vadd.f32 %v308_v23, %v239_v22 }
  0xf6   :  { %v417_v25 = vpop.f32.mrf.mxu0 }
  0xf7   :  { %v312_v26 = vmax.f32 %v309_v24, 0.0 }
  0xf9   :  { %313 = vst.msk [vmem:[%s684_s3] sm:$0xff] %vm98_vm1, %v312_v26 }

// kernel: dqn_forward.7
= control target key start
LH: loop header
LB: loop body
LE: loop exit
PB: predicated region body
PF: predicated region fallthrough
CT: control target
= control target key end

     0   :  { %s1270_s0 = inlined_call_operand.vmem [shape: f32[2,256], index: 0, kind: input, shape index: {}]   ;;  %s1271_s1 = inlined_call_operand.vmem [shape: f32[256,512], index: 1, kind: input, shape index: {}]   ;;  %s1272_s2 = inlined_call_operand.vmem [shape: f32[1,512], index: 2, kind: input, shape index: {}]   ;;  %s1273_s3 = inlined_call_operand.vmem [shape: f32[512,6], index: 3, kind: input, shape index: {}]   ;;  %s1274_s4 = inlined_call_operand.vmem [shape: f32[1,6], index: 4, kind: input, shape index: {}]   ;;  %s1275_s5 = inlined_call_operand.hbm [shape: f32[2,6], index: 5, kind: output, shape index: {}]  }
   0x1   :  { %v83_v0 = vld [vmem:[%s1271_s1 + $0x1e8] sm:$0xff]  ;;  %v85_v1 = vld [vmem:[%s1271_s1 + $0x1f8] sm:$0xff]  ;;  %v82_v2 = vld [vmem:[%s1271_s1 + $0x1e0] sm:$0xff] }
   0x2   :  { %183 = vmatprep.subr.mxu0 %v83_v0  ;;  %254 = vmatprep.subr.mxu1 %v85_v1  ;;  %v84_v3 = vld [vmem:[%s1271_s1 + $0x1f0] sm:$0xff]  ;;  %v79_v4 = vld [vmem:[%s1271_s1 + $0x1c8] sm:$0xff]  ;;  %v81_v5 = vld [vmem:[%s1271_s1 + $0x1d8] sm:$0xff] }
   0x3   :  { %184 = vmatpush1.msra.mxu0 %v82_v2  ;;  %255 = vmatpush1.msra.mxu1 %v84_v3  ;;  %v78_v6 = vld [vmem:[%s1271_s1 + $0x1c0] sm:$0xff]  ;;  %v80_v7 = vld [vmem:[%s1271_s1 + $0x1d0] sm:$0xff]  ;;  %v75_v8 = vld [vmem:[%s1271_s1 + $0x1a8] sm:$0xff] }
   0x4   :  { %185 = vmatprep.subr.mxu0 %v79_v4  ;;  %256 = vmatprep.subr.mxu1 %v81_v5  ;;  %v77_v9 = vld [vmem:[%s1271_s1 + $0x1b8] sm:$0xff]  ;;  %v74_v10 = vld [vmem:[%s1271_s1 + $0x1a0] sm:$0xff]  ;;  %v76_v11 = vld [vmem:[%s1271_s1 + $0x1b0] sm:$0xff] }
   0x5   :  { %186 = vmatpush1.msra.mxu0 %v78_v6  ;;  %257 = vmatpush1.msra.mxu1 %v80_v7  ;;  %v71_v12 = vld [vmem:[%s1271_s1 + $0x188] sm:$0xff]  ;;  %v73_v13 = vld [vmem:[%s1271_s1 + $0x198] sm:$0xff]  ;;  %v70_v14 = vld [vmem:[%s1271_s1 + $0x180] sm:$0xff] }
   0x6   :  { %187 = vmatprep.subr.mxu0 %v75_v8  ;;  %258 = vmatprep.subr.mxu1 %v77_v9  ;;  %v72_v15 = vld [vmem:[%s1271_s1 + $0x190] sm:$0xff]  ;;  %v67_v16 = vld [vmem:[%s1271_s1 + $0x168] sm:$0xff]  ;;  %v69_v17 = vld [vmem:[%s1271_s1 + $0x178] sm:$0xff] }
   0x7   :  { %188 = vmatpush1.msra.mxu0 %v74_v10  ;;  %259 = vmatpush1.msra.mxu1 %v76_v11  ;;  %v66_v18 = vld [vmem:[%s1271_s1 + $0x160] sm:$0xff]  ;;  %v68_v19 = vld [vmem:[%s1271_s1 + $0x170] sm:$0xff]  ;;  %v63_v20 = vld [vmem:[%s1271_s1 + $0x148] sm:$0xff] }
   0x8   :  { %189 = vmatprep.subr.mxu0 %v71_v12  ;;  %260 = vmatprep.subr.mxu1 %v73_v13  ;;  %v65_v21 = vld [vmem:[%s1271_s1 + $0x158] sm:$0xff]  ;;  %v62_v22 = vld [vmem:[%s1271_s1 + $0x140] sm:$0xff]  ;;  %v64_v23 = vld [vmem:[%s1271_s1 + $0x150] sm:$0xff] }
   0x9   :  { %190 = vmatpush1.msra.mxu0 %v70_v14  ;;  %261 = vmatpush1.msra.mxu1 %v72_v15  ;;  %v59_v24 = vld [vmem:[%s1271_s1 + $0x128] sm:$0xff]  ;;  %v61_v25 = vld [vmem:[%s1271_s1 + $0x138] sm:$0xff]  ;;  %v58_v26 = vld [vmem:[%s1271_s1 + $0x120] sm:$0xff] }
   0xa   :  { %191 = vmatprep.subr.mxu0 %v67_v16  ;;  %262 = vmatprep.subr.mxu1 %v69_v17  ;;  %v60_v27 = vld [vmem:[%s1271_s1 + $0x130] sm:$0xff]  ;;  %v55_v28 = vld [vmem:[%s1271_s1 + $0x108] sm:$0xff]  ;;  %v57_v29 = vld [vmem:[%s1271_s1 + $0x118] sm:$0xff] }
   0xb   :  { %192 = vmatpush1.msra.mxu0 %v66_v18  ;;  %263 = vmatpush1.msra.mxu1 %v68_v19  ;;  %v54_v30 = vld [vmem:[%s1271_s1 + $0x100] sm:$0xff]  ;;  %v56_v31 = vld [vmem:[%s1271_s1 + $0x110] sm:$0xff]  ;;  %v51_v32 = vld [vmem:[%s1271_s1 + $0xe8] sm:$0xff] }
   0xc   :  { %193 = vmatprep.subr.mxu0 %v63_v20  ;;  %264 = vmatprep.subr.mxu1 %v65_v21  ;;  %v53_v33 = vld [vmem:[%s1271_s1 + $0xf8] sm:$0xff]  ;;  %v50_v34 = vld [vmem:[%s1271_s1 + $0xe0] sm:$0xff]  ;;  %v52_v35 = vld [vmem:[%s1271_s1 + $0xf0] sm:$0xff] }
   0xd   :  { %194 = vmatpush1.msra.mxu0 %v62_v22  ;;  %265 = vmatpush1.msra.mxu1 %v64_v23  ;;  %v47_v36 = vld [vmem:[%s1271_s1 + $0xc8] sm:$0xff]  ;;  %v49_v37 = vld [vmem:[%s1271_s1 + $0xd8] sm:$0xff]  ;;  %v46_v38 = vld [vmem:[%s1271_s1 + $0xc0] sm:$0xff] }
   0xe   :  { %195 = vmatprep.subr.mxu0 %v59_v24  ;;  %266 = vmatprep.subr.mxu1 %v61_v25  ;;  %v48_v39 = vld [vmem:[%s1271_s1 + $0xd0] sm:$0xff]  ;;  %v43_v40 = vld [vmem:[%s1271_s1 + $0xa8] sm:$0xff]  ;;  %v45_v41 = vld [vmem:[%s1271_s1 + $0xb8] sm:$0xff] }
   0xf   :  { %196 = vmatpush1.msra.mxu0 %v58_v26  ;;  %267 = vmatpush1.msra.mxu1 %v60_v27  ;;  %v42_v42 = vld [vmem:[%s1271_s1 + $0xa0] sm:$0xff]  ;;  %v44_v43 = vld [vmem:[%s1271_s1 + $0xb0] sm:$0xff]  ;;  %v39_v44 = vld [vmem:[%s1271_s1 + $0x88] sm:$0xff] }
  0x10   :  { %197 = vmatprep.subr.mxu0 %v55_v28  ;;  %268 = vmatprep.subr.mxu1 %v57_v29  ;;  %v41_v45 = vld [vmem:[%s1271_s1 + $0x98] sm:$0xff]  ;;  %v38_v46 = vld [vmem:[%s1271_s1 + $0x80] sm:$0xff]  ;;  %v40_v47 = vld [vmem:[%s1271_s1 + $0x90] sm:$0xff] }
  0x11   :  { %198 = vmatpush1.msra.mxu0 %v54_v30  ;;  %269 = vmatpush1.msra.mxu1 %v56_v31  ;;  %v35_v48 = vld [vmem:[%s1271_s1 + $0x68] sm:$0xff]  ;;  %v37_v49 = vld [vmem:[%s1271_s1 + $0x78] sm:$0xff]  ;;  %v34_v50 = vld [vmem:[%s1271_s1 + $0x60] sm:$0xff] }
  0x12   :  { %199 = vmatprep.subr.mxu0 %v51_v32  ;;  %270 = vmatprep.subr.mxu1 %v53_v33  ;;  %v36_v51 = vld [vmem:[%s1271_s1 + $0x70] sm:$0xff]  ;;  %v31_v52 = vld [vmem:[%s1271_s1 + $0x48] sm:$0xff]  ;;  %v33_v53 = vld [vmem:[%s1271_s1 + $0x58] sm:$0xff] }
  0x13   :  { %200 = vmatpush1.msra.mxu0 %v50_v34  ;;  %271 = vmatpush1.msra.mxu1 %v52_v35  ;;  %v30_v54 = vld [vmem:[%s1271_s1 + $0x40] sm:$0xff]  ;;  %v32_v55 = vld [vmem:[%s1271_s1 + $0x50] sm:$0xff]  ;;  %v27_v56 = vld [vmem:[%s1271_s1 + $0x28] sm:$0xff] }
  0x14   :  { %201 = vmatprep.subr.mxu0 %v47_v36  ;;  %272 = vmatprep.subr.mxu1 %v49_v37  ;;  %v29_v57 = vld [vmem:[%s1271_s1 + $0x38] sm:$0xff]  ;;  %v26_v58 = vld [vmem:[%s1271_s1 + $0x20] sm:$0xff]  ;;  %v28_v59 = vld [vmem:[%s1271_s1 + $0x30] sm:$0xff] }
  0x15   :  { %202 = vmatpush1.msra.mxu0 %v46_v38  ;;  %273 = vmatpush1.msra.mxu1 %v48_v39  ;;  %v23_v60 = vld [vmem:[%s1271_s1 + $0x8] sm:$0xff]  ;;  %v25_v61 = vld [vmem:[%s1271_s1 + $0x18] sm:$0xff]  ;;  %v22_v62 = vld [vmem:[%s1271_s1] sm:$0xff] }
  0x16   :  { %203 = vmatprep.subr.mxu0 %v43_v40  ;;  %274 = vmatprep.subr.mxu1 %v45_v41  ;;  %v24_v63 = vld [vmem:[%s1271_s1 + $0x10] sm:$0xff]  ;;  %v147_v0 = vld [vmem:[%s1271_s1 + $0x3e8] sm:$0xff]  ;;  %v149_v1 = vld [vmem:[%s1271_s1 + $0x3f8] sm:$0xff] }
  0x17   :  { %204 = vmatpush1.msra.mxu0 %v42_v42  ;;  %275 = vmatpush1.msra.mxu1 %v44_v43  ;;  %v146_v2 = vld [vmem:[%s1271_s1 + $0x3e0] sm:$0xff]  ;;  %v148_v3 = vld [vmem:[%s1271_s1 + $0x3f0] sm:$0xff]  ;;  %v143_v4 = vld [vmem:[%s1271_s1 + $0x3c8] sm:$0xff] }
  0x18   :  { %205 = vmatprep.subr.mxu0 %v39_v44  ;;  %276 = vmatprep.subr.mxu1 %v41_v45  ;;  %v145_v5 = vld [vmem:[%s1271_s1 + $0x3d8] sm:$0xff]  ;;  %v142_v6 = vld [vmem:[%s1271_s1 + $0x3c0] sm:$0xff]  ;;  %v144_v7 = vld [vmem:[%s1271_s1 + $0x3d0] sm:$0xff] }
  0x19   :  { %206 = vmatpush1.msra.mxu0 %v38_v46  ;;  %277 = vmatpush1.msra.mxu1 %v40_v47  ;;  %v139_v8 = vld [vmem:[%s1271_s1 + $0x3a8] sm:$0xff]  ;;  %v141_v9 = vld [vmem:[%s1271_s1 + $0x3b8] sm:$0xff]  ;;  %v138_v10 = vld [vmem:[%s1271_s1 + $0x3a0] sm:$0xff] }
  0x1a   :  { %207 = vmatprep.subr.mxu0 %v35_v48  ;;  %278 = vmatprep.subr.mxu1 %v37_v49  ;;  %v140_v11 = vld [vmem:[%s1271_s1 + $0x3b0] sm:$0xff]  ;;  %v135_v12 = vld [vmem:[%s1271_s1 + $0x388] sm:$0xff]  ;;  %v137_v13 = vld [vmem:[%s1271_s1 + $0x398] sm:$0xff] }
  0x1b   :  { %208 = vmatpush1.msra.mxu0 %v34_v50  ;;  %279 = vmatpush1.msra.mxu1 %v36_v51  ;;  %v134_v14 = vld [vmem:[%s1271_s1 + $0x380] sm:$0xff]  ;;  %v136_v15 = vld [vmem:[%s1271_s1 + $0x390] sm:$0xff]  ;;  %v131_v16 = vld [vmem:[%s1271_s1 + $0x368] sm:$0xff] }
  0x1c   :  { %209 = vmatprep.subr.mxu0 %v31_v52  ;;  %280 = vmatprep.subr.mxu1 %v33_v53  ;;  %v133_v17 = vld [vmem:[%s1271_s1 + $0x378] sm:$0xff]  ;;  %v130_v18 = vld [vmem:[%s1271_s1 + $0x360] sm:$0xff]  ;;  %v132_v19 = vld [vmem:[%s1271_s1 + $0x370] sm:$0xff] }
  0x1d   :  { %210 = vmatpush1.msra.mxu0 %v30_v54  ;;  %281 = vmatpush1.msra.mxu1 %v32_v55  ;;  %v127_v20 = vld [vmem:[%s1271_s1 + $0x348] sm:$0xff]  ;;  %v129_v21 = vld [vmem:[%s1271_s1 + $0x358] sm:$0xff]  ;;  %v126_v22 = vld [vmem:[%s1271_s1 + $0x340] sm:$0xff] }
  0x1e   :  { %211 = vmatprep.subr.mxu0 %v27_v56  ;;  %282 = vmatprep.subr.mxu1 %v29_v57  ;;  %v128_v23 = vld [vmem:[%s1271_s1 + $0x350] sm:$0xff]  ;;  %v123_v24 = vld [vmem:[%s1271_s1 + $0x328] sm:$0xff]  ;;  %v125_v25 = vld [vmem:[%s1271_s1 + $0x338] sm:$0xff] }
  0x1f   :  { %212 = vmatpush1.msra.mxu0 %v26_v58  ;;  %283 = vmatpush1.msra.mxu1 %v28_v59  ;;  %v122_v26 = vld [vmem:[%s1271_s1 + $0x320] sm:$0xff]  ;;  %v124_v27 = vld [vmem:[%s1271_s1 + $0x330] sm:$0xff]  ;;  %v119_v28 = vld [vmem:[%s1271_s1 + $0x308] sm:$0xff] }
  0x20   :  { %213 = vmatprep.subr.mxu0 %v23_v60  ;;  %284 = vmatprep.subr.mxu1 %v25_v61  ;;  %v121_v29 = vld [vmem:[%s1271_s1 + $0x318] sm:$0xff]  ;;  %v118_v30 = vld [vmem:[%s1271_s1 + $0x300] sm:$0xff]  ;;  %v120_v31 = vld [vmem:[%s1271_s1 + $0x310] sm:$0xff] }
  0x21   :  { %214 = vmatpush1.msra.mxu0 %v22_v62  ;;  %285 = vmatpush1.msra.mxu1 %v24_v63  ;;  %v115_v32 = vld [vmem:[%s1271_s1 + $0x2e8] sm:$0xff]  ;;  %v117_v33 = vld [vmem:[%s1271_s1 + $0x2f8] sm:$0xff]  ;;  %v114_v34 = vld [vmem:[%s1271_s1 + $0x2e0] sm:$0xff] }
  0x22   :  { %215 = vmatprep.subr.mxu0 %v147_v0  ;;  %286 = vmatprep.subr.mxu1 %v149_v1  ;;  %v116_v35 = vld [vmem:[%s1271_s1 + $0x2f0] sm:$0xff]  ;;  %v111_v36 = vld [vmem:[%s1271_s1 + $0x2c8] sm:$0xff]  ;;  %v113_v37 = vld [vmem:[%s1271_s1 + $0x2d8] sm:$0xff] }
  0x23   :  { %216 = vmatpush2.msra.mxu0 %v146_v2  ;;  %287 = vmatpush2.msra.mxu1 %v148_v3  ;;  %v110_v38 = vld [vmem:[%s1271_s1 + $0x2c0] sm:$0xff]  ;;  %v112_v39 = vld [vmem:[%s1271_s1 + $0x2d0] sm:$0xff]  ;;  %v107_v40 = vld [vmem:[%s1271_s1 + $0x2a8] sm:$0xff] }
  0x24   :  { %217 = vmatprep.subr.mxu0 %v143_v4  ;;  %288 = vmatprep.subr.mxu1 %v145_v5  ;;  %v109_v41 = vld [vmem:[%s1271_s1 + $0x2b8] sm:$0xff]  ;;  %v106_v42 = vld [vmem:[%s1271_s1 + $0x2a0] sm:$0xff]  ;;  %v108_v43 = vld [vmem:[%s1271_s1 + $0x2b0] sm:$0xff] }
  0x25   :  { %218 = vmatpush2.msra.mxu0 %v142_v6  ;;  %289 = vmatpush2.msra.mxu1 %v144_v7  ;;  %v103_v44 = vld [vmem:[%s1271_s1 + $0x288] sm:$0xff]  ;;  %v105_v45 = vld [vmem:[%s1271_s1 + $0x298] sm:$0xff]  ;;  %v102_v46 = vld [vmem:[%s1271_s1 + $0x280] sm:$0xff] }
  0x26   :  { %219 = vmatprep.subr.mxu0 %v139_v8  ;;  %290 = vmatprep.subr.mxu1 %v141_v9  ;;  %v104_v47 = vld [vmem:[%s1271_s1 + $0x290] sm:$0xff]  ;;  %v99_v48 = vld [vmem:[%s1271_s1 + $0x268] sm:$0xff]  ;;  %v101_v49 = vld [vmem:[%s1271_s1 + $0x278] sm:$0xff] }
  0x27   :  { %220 = vmatpush2.msra.mxu0 %v138_v10  ;;  %291 = vmatpush2.msra.mxu1 %v140_v11  ;;  %v98_v50 = vld [vmem:[%s1271_s1 + $0x260] sm:$0xff]  ;;  %v100_v51 = vld [vmem:[%s1271_s1 + $0x270] sm:$0xff]  ;;  %v95_v52 = vld [vmem:[%s1271_s1 + $0x248] sm:$0xff] }
  0x28   :  { %221 = vmatprep.subr.mxu0 %v135_v12  ;;  %292 = vmatprep.subr.mxu1 %v137_v13  ;;  %v97_v53 = vld [vmem:[%s1271_s1 + $0x258] sm:$0xff]  ;;  %v94_v54 = vld [vmem:[%s1271_s1 + $0x240] sm:$0xff]  ;;  %v96_v55 = vld [vmem:[%s1271_s1 + $0x250] sm:$0xff] }
  0x29   :  { %222 = vmatpush2.msra.mxu0 %v134_v14  ;;  %293 = vmatpush2.msra.mxu1 %v136_v15  ;;  %v556_v56 = vld.sshfl [vmem:[%s1270_s0] sm:$0x33 pattern:$0x76325410]  ;;  %v91_v57 = vld [vmem:[%s1271_s1 + $0x228] sm:$0xff]  ;;  %v93_v58 = vld [vmem:[%s1271_s1 + $0x238] sm:$0xff] }
  0x2a   :  { %223 = vmatprep.subr.mxu0 %v131_v16  ;;  %294 = vmatprep.subr.mxu1 %v133_v17  ;;  %v90_v59 = vld [vmem:[%s1271_s1 + $0x220] sm:$0xff]  ;;  %v92_v60 = vld [vmem:[%s1271_s1 + $0x230] sm:$0xff] }
  0x2b   :  { %224 = vmatpush2.msra.mxu0 %v130_v18  ;;  %295 = vmatpush2.msra.mxu1 %v132_v19 }
  0x2c   :  { %225 = vmatprep.subr.mxu0 %v127_v20  ;;  %296 = vmatprep.subr.mxu1 %v129_v21 }
  0x2d   :  { %226 = vmatpush2.msra.mxu0 %v126_v22  ;;  %297 = vmatpush2.msra.mxu1 %v128_v23 }
  0x2e   :  { %227 = vmatprep.subr.mxu0 %v123_v24  ;;  %298 = vmatprep.subr.mxu1 %v125_v25 }
  0x2f   :  { %228 = vmatpush2.msra.mxu0 %v122_v26  ;;  %299 = vmatpush2.msra.mxu1 %v124_v27 }
  0x30   :  { %229 = vmatprep.subr.mxu0 %v119_v28  ;;  %300 = vmatprep.subr.mxu1 %v121_v29 }
  0x31   :  { %230 = vmatpush2.msra.mxu0 %v118_v30  ;;  %301 = vmatpush2.msra.mxu1 %v120_v31 }
  0x32   :  { %231 = vmatprep.subr.mxu0 %v115_v32  ;;  %302 = vmatprep.subr.mxu1 %v117_v33 }
  0x33   :  { %232 = vmatpush2.msra.mxu0 %v114_v34  ;;  %303 = vmatpush2.msra.mxu1 %v116_v35 }
  0x34   :  { %233 = vmatprep.subr.mxu0 %v111_v36  ;;  %304 = vmatprep.subr.mxu1 %v113_v37 }
  0x35   :  { %234 = vmatpush2.msra.mxu0 %v110_v38  ;;  %305 = vmatpush2.msra.mxu1 %v112_v39 }
  0x36   :  { %235 = vmatprep.subr.mxu0 %v107_v40  ;;  %306 = vmatprep.subr.mxu1 %v109_v41 }
  0x37   :  { %236 = vmatpush2.msra.mxu0 %v106_v42  ;;  %307 = vmatpush2.msra.mxu1 %v108_v43 }
  0x38   :  { %237 = vmatprep.subr.mxu0 %v103_v44  ;;  %308 = vmatprep.subr.mxu1 %v105_v45 }
  0x39   :  { %238 = vmatpush2.msra.mxu0 %v102_v46  ;;  %309 = vmatpush2.msra.mxu1 %v104_v47 }
  0x3a   :  { %239 = vmatprep.subr.mxu0 %v99_v48  ;;  %310 = vmatprep.subr.mxu1 %v101_v49 }
  0x3b   :  { %240 = vmatpush2.msra.mxu0 %v98_v50  ;;  %311 = vmatpush2.msra.mxu1 %v100_v51 }
  0x3c   :  { %241 = vmatprep.subr.mxu0 %v95_v52  ;;  %312 = vmatprep.subr.mxu1 %v97_v53 }
  0x3d   :  { %10 = vsyncpa [#allocation3], 0  ;;  %242 = vmatpush2.msra.mxu0 %v94_v54  ;;  %313 = vmatpush2.msra.mxu1 %v96_v55  ;;  %v87_v61 = vld [vmem:[%s1271_s1 + $0x208] sm:$0xff]  ;;  %v89_v62 = vld [vmem:[%s1271_s1 + $0x218] sm:$0xff]  ;;  %v180_v63 = vcombine.high %v556_v56, %v556_v56  ;;  %s651_s20 = smov [#allocation2]   ;;  %vm540_vm0 = vcmask 41984  }
  0x3e   :  { %243 = vmatprep.subr.mxu0 %v91_v57  ;;  %314 = vmatprep.subr.mxu1 %v93_v58  ;;  %v86_v0 = vld [vmem:[%s1271_s1 + $0x200] sm:$0xff]  ;;  %v88_v1 = vld [vmem:[%s1271_s1 + $0x210] sm:$0xff]  ;;  %v360_v2 = vld [vmem:[%s1273_s3 + $0xf8] sm:$0xff]  ;;  %s548_s21 = sshll.u32 %s651_s20, 4  ;;  %s549_s21 = int_to_ptr.vmem [resolvable:$true] %s548_s21 }
  0x3f   :  { %244 = vmatpush2.msra.mxu0 %v90_v59  ;;  %315 = vmatpush2.msra.mxu1 %v92_v60  ;;  %v392_v3 = vld [vmem:[%s1273_s3 + $0x1f8] sm:$0xff]  ;;  %v359_v6 = vld [vmem:[%s1273_s3 + $0xf0] sm:$0xff]  ;;  %v358_v10 = vld [vmem:[%s1273_s3 + $0xe8] sm:$0xff]  ;;  %s629_s22 = scalar_lea.vmem %s549_s21, 32  ;;  %p634_p1 = scmp.lt.s32.totalorder %s549_s21, %s549_s21 }
  0x40   :  { %245 = vmatprep.subr.mxu0 %v87_v61  ;;  %316 = vmatprep.subr.mxu1 %v89_v62  ;;  %v344_v4 = vld [vmem:[%s1273_s3 + $0x78] sm:$0xff]  ;;  %v391_v7 = vld [vmem:[%s1273_s3 + $0x1f0] sm:$0xff]  ;;  %v390_v11 = vld [vmem:[%s1273_s3 + $0x1e8] sm:$0xff]  ;;  %p630_p0 = scmp.ne.s32.totalorder %s549_s21, %s629_s22  ;;  %p635_p2 = scmp.lt.s32.totalorder %s629_s22, %s629_s22 }
  0x41   :  { %246 = vmatpush2.msra.mxu0 %v86_v0  ;;  %247 = vmatprep.mubr.f32.mxu0 %v180_v63  ;;  %v376_v5 = vld [vmem:[%s1273_s3 + $0x178] sm:$0xff]  ;;  %v343_v8 = vld [vmem:[%s1273_s3 + $0x70] sm:$0xff]  ;;  %v342_v12 = vld [vmem:[%s1273_s3 + $0x68] sm:$0xff] }
  0x42   :  { %317 = vmatpush2.msra.mxu1 %v88_v1  ;;  %318 = vmatprep.mubr.f32.mxu1 %v180_v63  ;;  %v375_v9 = vld [vmem:[%s1273_s3 + $0x170] sm:$0xff]  ;;  %v374_v13 = vld [vmem:[%s1273_s3 + $0x168] sm:$0xff]  ;;  %v357_v14 = vld [vmem:[%s1273_s3 + $0xe0] sm:$0xff]  ;;  %p636_p3 = por %p635_p2, %p634_p1 }
  0x43   :  { %248 = vmatmul.mubr.f32.vlgmr.msra.gmra.mxu0 %v556_v56  ;;  %319 = vmatmul.mubr.f32.vlgmr.msra.gmra.mxu1 %v556_v56  ;;  %v389_v15 = vld [vmem:[%s1273_s3 + $0x1e0] sm:$0xff]  ;;  %v356_v18 = vld [vmem:[%s1273_s3 + $0xd8] sm:$0xff]  ;;  %v355_v22 = vld [vmem:[%s1273_s3 + $0xd0] sm:$0xff] }
  0x44   :  { %558 = vmatprep.subr.mxu0 %v360_v2  ;;  %593 = vmatprep.subr.mxu1 %v392_v3  ;;  %v341_v16 = vld [vmem:[%s1273_s3 + $0x60] sm:$0xff]  ;;  %v388_v19 = vld [vmem:[%s1273_s3 + $0x1d8] sm:$0xff]  ;;  %v387_v23 = vld [vmem:[%s1273_s3 + $0x1d0] sm:$0xff]  ;;  %v152_v2 = vlaneseq  ;;  %p637_p4 = pnand %p636_p3, %p630_p0 }
  0x45   :  { %559 = vmatpush3.msra.mxu0 %v344_v4  ;;  %594 = vmatpush3.msra.mxu1 %v376_v5  ;;  %v373_v17 = vld [vmem:[%s1273_s3 + $0x160] sm:$0xff]  ;;  %v340_v20 = vld [vmem:[%s1273_s3 + $0x58] sm:$0xff]  ;;  %v339_v24 = vld [vmem:[%s1273_s3 + $0x50] sm:$0xff] }
  0x46   :  { %560 = vmatprep.subr.mxu0 %v359_v6  ;;  %595 = vmatprep.subr.mxu1 %v391_v7  ;;  %v372_v21 = vld [vmem:[%s1273_s3 + $0x158] sm:$0xff]  ;;  %v371_v25 = vld [vmem:[%s1273_s3 + $0x150] sm:$0xff]  ;;  %v354_v26 = vld [vmem:[%s1273_s3 + $0xc8] sm:$0xff]  ;;  %v153_v3 = vshrl.u32 %v152_v2, 7 }
  0x47   :  { %561 = vmatpush3.msra.mxu0 %v343_v8  ;;  %596 = vmatpush3.msra.mxu1 %v375_v9  ;;  %v386_v27 = vld [vmem:[%s1273_s3 + $0x1c8] sm:$0xff]  ;;  %v353_v30 = vld [vmem:[%s1273_s3 + $0xc0] sm:$0xff]  ;;  %v352_v34 = vld [vmem:[%s1273_s3 + $0xb8] sm:$0xff] }
  0x48   :  { %562 = vmatprep.subr.mxu0 %v358_v10  ;;  %597 = vmatprep.subr.mxu1 %v390_v11  ;;  %v338_v28 = vld [vmem:[%s1273_s3 + $0x48] sm:$0xff]  ;;  %v385_v31 = vld [vmem:[%s1273_s3 + $0x1c0] sm:$0xff]  ;;  %v384_v35 = vld [vmem:[%s1273_s3 + $0x1b8] sm:$0xff]  ;;  %v162_v4 = vsub.s32 2, %v153_v3  ;;  %v154_v5 = vsub.s32 0, %v153_v3  ;;  %v158_v7 = vsub.s32 1, %v153_v3 }
  0x49   :  { %563 = vmatpush3.msra.mxu0 %v342_v12  ;;  %598 = vmatpush3.msra.mxu1 %v374_v13  ;;  %v370_v29 = vld [vmem:[%s1273_s3 + $0x148] sm:$0xff]  ;;  %v337_v32 = vld [vmem:[%s1273_s3 + $0x40] sm:$0xff]  ;;  %v336_v36 = vld [vmem:[%s1273_s3 + $0x38] sm:$0xff]  ;;  %v166_v8 = vsub.s32 3, %v153_v3 }
  0x4a   :  { %564 = vmatprep.subr.mxu0 %v357_v14  ;;  %599 = vmatprep.subr.mxu1 %v389_v15  ;;  %v369_v33 = vld [vmem:[%s1273_s3 + $0x140] sm:$0xff]  ;;  %v368_v37 = vld [vmem:[%s1273_s3 + $0x138] sm:$0xff]  ;;  %v351_v38 = vld [vmem:[%s1273_s3 + $0xb0] sm:$0xff] }
  0x4b   :  { %565 = vmatpush3.msra.mxu0 %v341_v16  ;;  %600 = vmatpush3.msra.mxu1 %v373_v17  ;;  %v383_v39 = vld [vmem:[%s1273_s3 + $0x1b0] sm:$0xff]  ;;  %v350_v42 = vld [vmem:[%s1273_s3 + $0xa8] sm:$0xff]  ;;  %v349_v46 = vld [vmem:[%s1273_s3 + $0xa0] sm:$0xff] }
  0x4c   :  { %566 = vmatprep.subr.mxu0 %v356_v18  ;;  %601 = vmatprep.subr.mxu1 %v388_v19  ;;  %v335_v40 = vld [vmem:[%s1273_s3 + $0x30] sm:$0xff]  ;;  %v382_v43 = vld [vmem:[%s1273_s3 + $0x1a8] sm:$0xff]  ;;  %v381_v47 = vld [vmem:[%s1273_s3 + $0x1a0] sm:$0xff] }
  0x4d   :  { %567 = vmatpush3.msra.mxu0 %v340_v20  ;;  %602 = vmatpush3.msra.mxu1 %v372_v21  ;;  %v367_v41 = vld [vmem:[%s1273_s3 + $0x130] sm:$0xff]  ;;  %v334_v44 = vld [vmem:[%s1273_s3 + $0x28] sm:$0xff]  ;;  %v333_v48 = vld [vmem:[%s1273_s3 + $0x20] sm:$0xff] }
  0x4e   :  { %568 = vmatprep.subr.mxu0 %v355_v22  ;;  %603 = vmatprep.subr.mxu1 %v387_v23  ;;  %v366_v45 = vld [vmem:[%s1273_s3 + $0x128] sm:$0xff]  ;;  %v365_v49 = vld [vmem:[%s1273_s3 + $0x120] sm:$0xff]  ;;  %v348_v50 = vld [vmem:[%s1273_s3 + $0x98] sm:$0xff] }
  0x4f   :  { %569 = vmatpush3.msra.mxu0 %v339_v24  ;;  %604 = vmatpush3.msra.mxu1 %v371_v25  ;;  %v380_v51 = vld [vmem:[%s1273_s3 + $0x198] sm:$0xff]  ;;  %v347_v54 = vld [vmem:[%s1273_s3 + $0x90] sm:$0xff]  ;;  %v346_v58 = vld [vmem:[%s1273_s3 + $0x88] sm:$0xff] }
  0x50   :  { %570 = vmatprep.subr.mxu0 %v354_v26  ;;  %605 = vmatprep.subr.mxu1 %v386_v27  ;;  %v332_v52 = vld [vmem:[%s1273_s3 + $0x18] sm:$0xff]  ;;  %v379_v55 = vld [vmem:[%s1273_s3 + $0x190] sm:$0xff]  ;;  %v378_v59 = vld [vmem:[%s1273_s3 + $0x188] sm:$0xff] }
  0x51   :  { %571 = vmatpush3.msra.mxu0 %v338_v28  ;;  %606 = vmatpush3.msra.mxu1 %v370_v29  ;;  %v364_v53 = vld [vmem:[%s1273_s3 + $0x118] sm:$0xff]  ;;  %v331_v56 = vld [vmem:[%s1273_s3 + $0x10] sm:$0xff]  ;;  %v330_v60 = vld [vmem:[%s1273_s3 + $0x8] sm:$0xff] }
  0x52   :  { %572 = vmatprep.subr.mxu0 %v353_v30  ;;  %607 = vmatprep.subr.mxu1 %v385_v31  ;;  %v363_v57 = vld [vmem:[%s1273_s3 + $0x110] sm:$0xff]  ;;  %v362_v61 = vld [vmem:[%s1273_s3 + $0x108] sm:$0xff]  ;;  %v345_v62 = vld [vmem:[%s1273_s3 + $0x80] sm:$0xff] }
  0x53   :  { %573 = vmatpush3.msra.mxu0 %v337_v32  ;;  %608 = vmatpush3.msra.mxu1 %v369_v33  ;;  %v377_v63 = vld [vmem:[%s1273_s3 + $0x180] sm:$0xff] }
  0x54   :  { %574 = vmatprep.subr.mxu0 %v352_v34  ;;  %609 = vmatprep.subr.mxu1 %v384_v35  ;;  %v329_v0 = vld [vmem:[%s1273_s3] sm:$0xff] }
  0x55   :  { %575 = vmatpush3.msra.mxu0 %v336_v36  ;;  %610 = vmatpush3.msra.mxu1 %v368_v37  ;;  %v361_v1 = vld [vmem:[%s1273_s3 + $0x100] sm:$0xff] }
  0x56   :  { %576 = vmatprep.subr.mxu0 %v351_v38  ;;  %611 = vmatprep.subr.mxu1 %v383_v39  ;;  %v150_v6 = vld [vmem:[%s1272_s2] sm:$0xf] }
  0x57   :  { %577 = vmatpush3.msra.mxu0 %v335_v40  ;;  %612 = vmatpush3.msra.mxu1 %v367_v41  ;;  %v163_v9 = vrot.slane %v150_v6, %v162_v4  ;;  %v155_v10 = vrot.slane %v150_v6, %v154_v5  ;;  %v159_v11 = vrot.slane %v150_v6, %v158_v7  ;;  %v557_v27 = vld [vmem:[%s1274_s4] ss:$0 sm:$0xff] }
  0x58   :  { %578 = vmatprep.subr.mxu0 %v350_v42  ;;  %613 = vmatprep.subr.mxu1 %v382_v43  ;;  %v167_v12 = vrot.slane %v150_v6, %v166_v8 }
  0x59   :  { %579 = vmatpush3.msra.mxu0 %v334_v44  ;;  %614 = vmatpush3.msra.mxu1 %v366_v45 }
  0x5a   :  { %580 = vmatprep.subr.mxu0 %v349_v46  ;;  %615 = vmatprep.subr.mxu1 %v381_v47 }
  0x5b   :  { %581 = vmatpush3.msra.mxu0 %v333_v48  ;;  %616 = vmatpush3.msra.mxu1 %v365_v49 }
  0x5c   :  { %582 = vmatprep.subr.mxu0 %v348_v50  ;;  %617 = vmatprep.subr.mxu1 %v380_v51 }
  0x5d   :  { %583 = vmatpush3.msra.mxu0 %v332_v52  ;;  %618 = vmatpush3.msra.mxu1 %v364_v53 }
  0x5e   :  { %584 = vmatprep.subr.mxu0 %v347_v54  ;;  %619 = vmatprep.subr.mxu1 %v379_v55 }
  0x5f   :  { %585 = vmatpush3.msra.mxu0 %v331_v56  ;;  %620 = vmatpush3.msra.mxu1 %v363_v57 }
  0x60   :  { %586 = vmatprep.subr.mxu0 %v346_v58  ;;  %621 = vmatprep.subr.mxu1 %v378_v59 }
  0x61   :  { %587 = vmatpush3.msra.mxu0 %v330_v60  ;;  %622 = vmatpush3.msra.mxu1 %v362_v61 }
  0x62   :  { %588 = vmatprep.subr.mxu0 %v345_v62  ;;  %623 = vmatprep.subr.mxu1 %v377_v63 }
  0x63   :  { %589 = vmatpush3.msra.mxu0 %v329_v0  ;;  %624 = vmatpush3.msra.mxu1 %v361_v1 }
 0x103   :  { %v249_v13 = vpop.f32.mrf.mxu0  ;;  %v320_v14 = vpop.f32.mrf.mxu1 }
 0x104   :  { %v321_v15 = vadd.f32 %v320_v14, %v163_v9  ;;  %v250_v16 = vadd.f32 %v249_v13, %v155_v10 }
 0x105   :  { %v251_v17 = vpop.f32.mrf.mxu0  ;;  %v322_v18 = vpop.f32.mrf.mxu1 }
 0x106   :  { %v252_v19 = vadd.f32 %v251_v17, %v159_v11  ;;  %v323_v20 = vadd.f32 %v322_v18, %v167_v12  ;;  %v327_v21 = vmax.f32 %v321_v15, 0.0  ;;  %v325_v24 = vmax.f32 %v250_v16, 0.0 }
 0x108   :  { %v326_v22 = vmax.f32 %v252_v19, 0.0  ;;  %v328_v23 = vmax.f32 %v323_v20, 0.0 }
 0x10a   :  { %464 = vmatprep.mubr.f32.mxu0 %v326_v22  ;;  %534 = vmatprep.mubr.f32.mxu1 %v328_v23 }
 0x10b   :  { %465 = vmatmul.mubr.f32.vlgmr.msra.gmra.mxu0 %v325_v24  ;;  %535 = vmatmul.mubr.f32.vlgmr.msra.gmra.mxu1 %v327_v21 }
 0x1cb   :  { %v590_v25 = vpop.f32.mrf.mxu0  ;;  %v625_v26 = vpop.f32.mrf.mxu1 }
 0x1cd   :  { %v591_v28 = vpop.f32.mrf.mxu0  ;;  %v626_v29 = vpop.f32.mrf.mxu1 }
 0x1ce   :  { %v592_v30 = vadd.f32 %v591_v28, %v590_v25  ;;  %v627_v32 = vadd.f32 %v626_v29, %v625_v26 }
 0x1d0   :  { %v467_v31 = vadd.f32 %v592_v30, %v557_v27 }
 0x1d2   :  { %v537_v33 = vadd.f32 %v627_v32, %v467_v31 }
 0x1d4   :  { %541 = vst.msk [vmem:[#allocation2] sm:$0x3] %vm540_vm0, %v537_v33 }
 0x1d5   :  { %640 = shalt.err (!%p637_p4)
}
 0x1d6   :  { %551 = dma.vmem_to_hbm [thread:$0]  %s549_s21, 32, %s1275_s5, [#allocation3]  }
 0x1d7   :  { %649 = dma.done.wait [#allocation3], 32  }
 0x1d8   :  { %650 = vsyncadd [#allocation3], 4294967264 }
 0x1d9   :  { %555 = vsyncpa [#allocation3], 1 }

</bundles_post_ra>
